<compile_context>
chip_gen: v5e
topology: v5e:2x2
jax: 0.10.0
libtpu: 0.0.40
codegen_flags: <defaults>
</compile_context>

<pallas_src>
import functools
import math

import jax
import jax.numpy as jnp
from jax import lax
from jax.experimental import pallas as pl
from jax.experimental.pallas import tpu as pltpu


def _round_up(v, n):
    return (v + n - 1) // n * n


def _vmem_bytes_estimate(tq, s_pad, m_pad, a_pad):
    """Rough resident-VMEM estimate for one grid step (generous on temps)."""
    b = 0
    b += 2 * 2 * s_pad * a_pad        # q_full + v_full (bf16, single-buffered)
    b += 2 * 2 * m_pad * a_pad        # w_k + w_o        (bf16, single-buffered)
    b += 4 * s_pad                    # bias row (f32)
    b += 2 * 2 * tq * m_pad           # x row tile (bf16, double-buffered)
    b += 2 * 4 * tq * m_pad           # attention-out tile (f32, double-buffered)
    b += 2 * 4 * tq * s_pad           # weight tile (f32, double-buffered)
    b += 3 * 4 * tq * s_pad           # logits / p / w live f32 intermediates
    return b


def _choose_tiling(S, m_pad, a_pad, vmem_budget_bytes):
    """Pick (tile_rows, S_pad): biggest tile that fits VMEM, >=2 tiles when possible."""
    s_pad = _round_up(S, 128)
    for tq in (512, 256, 128):
        if s_pad % tq != 0:
            continue
        if s_pad // tq < 2 and s_pad > 128:
            continue                      # keep >=2 row tiles for the v7x 2-TC split
        if _vmem_bytes_estimate(tq, s_pad, m_pad, a_pad) <= vmem_budget_bytes:
            return tq, s_pad
    return 64, s_pad                      # 64-row tiles always divide a 128 multiple


def _attention_kernel(x_ref, w_k_ref, q_ref, v_ref, w_o_ref, bias_ref,
                      out_ref, weight_ref, *, apply_mask):
    """One grid step: `tile_rows` rows of `attention` and of `weight`.

    x_ref      : (TQ, m_pad)      bf16   query-row tile of the padded input
    w_k_ref    : (m_pad, A_pad)   bf16   K.weight.T (zero padded)
    q_ref      : (S_pad, A_pad)   bf16   precomputed Q2 * 1/sqrt(A)
    v_ref      : (S_pad, A_pad)   bf16   precomputed V2
    w_o_ref    : (A_pad, m_pad)   bf16   output.weight.T (zero padded)
    bias_ref   : (1, S_pad)       f32    0 on valid key columns, -1e30 on padding
    out_ref    : (TQ, m_pad)      f32
    weight_ref : (TQ, S_pad)      f32
    """
    f32 = jnp.float32
    bf16 = jnp.bfloat16

    # Per-tile K projection on the MXU (bf16 operands, f32 accumulation).
    k_tile = jnp.dot(x_ref[...], w_k_ref[...], preferred_element_type=f32)

    # logits[i, j] = <k_i, q_j> (1/sqrt(A) already folded into q).
    # Contract the last axes directly -> no transpose / XLU traffic.
    logits = lax.dot_general(
        k_tile.astype(bf16), q_ref[...],
        dimension_numbers=(((1,), (1,)), ((), ())),
        preferred_element_type=f32)                               # (TQ, S_pad)

    if apply_mask:  # static Python bool: only when S < S_pad
        logits = logits + bias_ref[...]

    # Numerically stable softmax, all in f32. Exact divide: `weight` is a
    # module output, and the divide is nowhere near the binding slot.
    m_max = jnp.max(logits, axis=-1, keepdims=True)
    p = jnp.exp(logits - m_max)
    denom = jnp.sum(p, axis=-1, keepdims=True)
    w = p / denom                                                 # (TQ, S_pad) f32

    ctx = jnp.dot(w.astype(bf16), v_ref[...], preferred_element_type=f32)
    out = jnp.dot(ctx.astype(bf16), w_o_ref[...], preferred_element_type=f32)

    out_ref[...] = out
    weight_ref[...] = w


def self_attention_pallas(x, wk, wq, wv, wo, attention_size, *, tile_rows=None):
    """x: (1, S, m); wk/wq/wv: (A, m); wo: (m, A). Returns (attention, weight)."""
    assert x.ndim == 3 and x.shape[0] == 1
    S, m = x.shape[1], x.shape[2]
    A = attention_size
    assert wk.shape == (A, m) and wq.shape == (A, m) and wv.shape == (A, m)
    assert wo.shape == (m, A)

    f32, bf16 = jnp.float32, jnp.bfloat16
    m_pad = _round_up(m, 128)
    A_pad = _round_up(A, 128)

    # Generation-aware VMEM budget (v5e/v6e: 128 MiB physical, v7x: 64 MiB).
    try:
        vmem_physical = int(pltpu.get_tpu_info().vmem_capacity_bytes)
    except Exception:
        vmem_physical = 64 * 1024 * 1024
    vmem_limit = min((vmem_physical * 3) // 4, 112 * 1024 * 1024)

    if tile_rows is None:
        TQ, S_pad = _choose_tiling(S, m_pad, A_pad, int(vmem_limit * 0.8))
    else:
        TQ = tile_rows
        S_pad = _round_up(S, max(TQ, 128))
    n_tiles = S_pad // TQ

    # Zero-padding is exact for every matmul (padded contraction rows/cols are 0);
    # only the softmax needs the padded-key-column bias below.
    scale = 1.0 / math.sqrt(float(A))
    x2 = jnp.zeros((S_pad, m_pad), f32).at[:S, :m].set(x[0].astype(f32))
    w_k = jnp.zeros((m_pad, A_pad), f32).at[:m, :A].set(wk.T.astype(f32))
    w_q = jnp.zeros((m_pad, A_pad), f32).at[:m, :A].set(wq.T.astype(f32) * scale)
    w_v = jnp.zeros((m_pad, A_pad), f32).at[:m, :A].set(wv.T.astype(f32))
    w_o = jnp.zeros((A_pad, m_pad), f32).at[:A, :m].set(wo.T.astype(f32))

    # Hoisted full-sequence Q/V projections: one XLA matmul each (f32 accumulate),
    # single bf16 rounding before they become constant MXU operands in the kernel.
    q_full = jnp.dot(x2, w_q, preferred_element_type=f32).astype(bf16)
    v_full = jnp.dot(x2, w_v, preferred_element_type=f32).astype(bf16)

    x_bf = x2.astype(bf16)
    w_k_bf = w_k.astype(bf16)
    w_o_bf = w_o.astype(bf16)

    # Additive key-column mask, statically skipped when S is 128-aligned.
    apply_mask = (S != S_pad)
    bias = jnp.where(jnp.arange(S_pad) < S, 0.0, -1e30).astype(f32).reshape(1, S_pad)

    flops = 2 * (
        S_pad * m_pad * A_pad          # K projection (tiled over the grid)
        + S_pad * S_pad * A_pad        # logits
        + S_pad * S_pad * A_pad        # ctx
        + S_pad * A_pad * m_pad        # output projection
    )
    bytes_accessed = (
        2 * (S_pad * m_pad             # x (bf16)
             + m_pad * A_pad           # w_k
             + 2 * S_pad * A_pad       # q_full + v_full
             + A_pad * m_pad)          # w_o
        + 4 * S_pad                    # bias row
        + 4 * (S_pad * m_pad + S_pad * S_pad)   # f32 outputs
    )
    cost = pl.CostEstimate(flops=int(flops),
                           transcendentals=int(S_pad * S_pad),
                           bytes_accessed=int(bytes_accessed))

    kernel = functools.partial(_attention_kernel, apply_mask=apply_mask)

    def _build(constant_pipeline_mode):
        const_kw = ({} if constant_pipeline_mode is None
                    else dict(pipeline_mode=constant_pipeline_mode))
        return pl.pallas_call(
            kernel,
            out_shape=(
                jax.ShapeDtypeStruct((S_pad, m_pad), f32),
                jax.ShapeDtypeStruct((S_pad, S_pad), f32),
            ),
            grid_spec=pltpu.PrefetchScalarGridSpec(
                num_scalar_prefetch=0,
                grid=(n_tiles,),
                in_specs=[
                    pl.BlockSpec((TQ, m_pad), lambda i: (i, 0)),                # x row tile
                    pl.BlockSpec((m_pad, A_pad), lambda i: (0, 0), **const_kw),  # w_k
                    pl.BlockSpec((S_pad, A_pad), lambda i: (0, 0), **const_kw),  # q_full
                    pl.BlockSpec((S_pad, A_pad), lambda i: (0, 0), **const_kw),  # v_full
                    pl.BlockSpec((A_pad, m_pad), lambda i: (0, 0), **const_kw),  # w_o
                    pl.BlockSpec((1, S_pad), lambda i: (0, 0), **const_kw),      # key bias
                ],
                out_specs=(
                    pl.BlockSpec((TQ, m_pad), lambda i: (i, 0)),   # attention rows
                    pl.BlockSpec((TQ, S_pad), lambda i: (i, 0)),   # weight rows
                ),
            ),
            compiler_params=pltpu.CompilerParams(
                dimension_semantics=("parallel",),
                vmem_limit_bytes=int(vmem_limit),
            ),
            cost_estimate=cost,
        )

    args = (x_bf, w_k_bf, q_full, v_full, w_o_bf, bias)
    try:
        out_pad, weight_pad = _build(pl.Buffered(1))(*args)
    except Exception:
        # Fallback if this JAX build rejects pipeline_mode=pl.Buffered(1).
        out_pad, weight_pad = _build(None)(*args)

    attention = out_pad[:S, :m][None, :, :]      # (1, S, m) — matches unsqueeze(0)
    weight = weight_pad[:S, :S]                  # (S, S)
    return attention, weight


def _reference(x, wk, wq, wv, wo, A):
    x2 = x[0]
    k = x2 @ wk.T
    q = x2 @ wq.T
    v = x2 @ wv.T
    logits = (k @ q.T) / jnp.sqrt(jnp.float32(A))
    w = jax.nn.softmax(logits, axis=-1)
    ctx = w @ v
    out = ctx @ wo.T
    return out[None], w


if __name__ == "__main__":
    # Small shapes consistent with the module: batch=1 (module squeezes dim 0),
    # seq=8, input_size m=32, attention_size A=16.
    S, M, A = 8, 32, 16

    key = jax.random.PRNGKey(0)
    kx, kk, kq, kv, ko = jax.random.split(key, 5)

    x = jax.random.normal(kx, (1, S, M), dtype=jnp.float32)
    # Deterministic "Linear(bias=False)" weight init (kaiming-uniform-like bounds).
    bound_in = 1.0 / math.sqrt(M)
    bound_att = 1.0 / math.sqrt(A)
    wk = jax.random.uniform(kk, (A, M), jnp.float32, -bound_in, bound_in)
    wq = jax.random.uniform(kq, (A, M), jnp.float32, -bound_in, bound_in)
    wv = jax.random.uniform(kv, (A, M), jnp.float32, -bound_in, bound_in)
    wo = jax.random.uniform(ko, (M, A), jnp.float32, -bound_att, bound_att)

    attention, weight = self_attention_pallas(x, wk, wq, wv, wo, A)
    jax.block_until_ready((attention, weight))

    ref_attn, ref_w = _reference(x, wk, wq, wv, wo, A)
    assert attention.shape == (1, S, M) and weight.shape == (S, S)
    # Tolerance accounts for bf16 MXU operands (f32 accumulation, f32 softmax).
    assert jnp.allclose(attention, ref_attn, atol=2e-2, rtol=2e-2)
    assert jnp.allclose(weight, ref_w, atol=2e-2, rtol=2e-2)
    assert jnp.allclose(weight.sum(axis=-1), 1.0, atol=1e-3)

    print("KERNEL_OK")
</pallas_src>

<mosaic_0001>
module attributes {stable_mosaic.version = 11 : i64} {
  func.func @_attention_kernel(%arg0: i32, %arg1: memref<128x128xbf16, #tpu.memory_space<vmem>>, %arg2: memref<128x128xbf16, #tpu.memory_space<vmem>>, %arg3: memref<128x128xbf16, #tpu.memory_space<vmem>>, %arg4: memref<128x128xbf16, #tpu.memory_space<vmem>>, %arg5: memref<128x128xbf16, #tpu.memory_space<vmem>>, %arg6: memref<1x128xf32, #tpu.memory_space<vmem>>, %arg7: memref<128x128xf32, #tpu.memory_space<vmem>>, %arg8: memref<128x128xf32, #tpu.memory_space<vmem>>) attributes {dimension_semantics = [#tpu.dimension_semantics<parallel>], iteration_bounds = array<i64: 1>, scalar_prefetch = 0 : i64, scratch_operands = 0 : i64, tpu.core_type = #tpu.core_type<tc>, window_params = [{transform_indices = @transform_0, window_bounds = array<i64: 128, 128>}, {pipeline_mode = #tpu.pipeline_mode<synchronous>, transform_indices = @transform_1, window_bounds = array<i64: 128, 128>}, {pipeline_mode = #tpu.pipeline_mode<synchronous>, transform_indices = @transform_2, window_bounds = array<i64: 128, 128>}, {pipeline_mode = #tpu.pipeline_mode<synchronous>, transform_indices = @transform_3, window_bounds = array<i64: 128, 128>}, {pipeline_mode = #tpu.pipeline_mode<synchronous>, transform_indices = @transform_4, window_bounds = array<i64: 128, 128>}, {pipeline_mode = #tpu.pipeline_mode<synchronous>, transform_indices = @transform_5, window_bounds = array<i64: 1, 128>}, {transform_indices = @transform_6, window_bounds = array<i64: 128, 128>}, {transform_indices = @transform_7, window_bounds = array<i64: 128, 128>}]} {
    %c0 = arith.constant 0 : index
    %c0_0 = arith.constant 0 : index
    %0 = vector.load %arg1[%c0, %c0_0] : memref<128x128xbf16, #tpu.memory_space<vmem>>, vector<128x128xbf16>
    %c0_1 = arith.constant 0 : index
    %c0_2 = arith.constant 0 : index
    %1 = vector.load %arg2[%c0_1, %c0_2] : memref<128x128xbf16, #tpu.memory_space<vmem>>, vector<128x128xbf16>
    %cst = arith.constant dense<0.000000e+00> : vector<128x128xf32>
    %2 = tpu.matmul %0, %1, %cst {dimension_numbers = #tpu.dot_dimension_numbers<[1], [0], [0], [1], [0, 0, 1, 1], [], []>} : vector<128x128xbf16>, vector<128x128xbf16>, vector<128x128xf32> -> vector<128x128xf32>
    %3 = arith.truncf %2 : vector<128x128xf32> to vector<128x128xbf16>
    %c0_3 = arith.constant 0 : index
    %c0_4 = arith.constant 0 : index
    %4 = vector.load %arg3[%c0_3, %c0_4] : memref<128x128xbf16, #tpu.memory_space<vmem>>, vector<128x128xbf16>
    %cst_5 = arith.constant dense<0.000000e+00> : vector<128x128xf32>
    %5 = tpu.matmul %3, %4, %cst_5 {dimension_numbers = #tpu.dot_dimension_numbers<[1], [1], [0], [0], [0, 0, 1, 0], [], []>} : vector<128x128xbf16>, vector<128x128xbf16>, vector<128x128xf32> -> vector<128x128xf32>
    %c0_6 = arith.constant 0 : index
    %c0_7 = arith.constant 0 : index
    %6 = vector.load %arg6[%c0_6, %c0_7] : memref<1x128xf32, #tpu.memory_space<vmem>>, vector<1x128xf32>
    %7 = vector.broadcast %6 : vector<1x128xf32> to vector<128x128xf32>
    %8 = arith.addf %5, %7 : vector<128x128xf32>
    %cst_8 = arith.constant dense<0xFF800000> : vector<128xf32>
    %9 = vector.multi_reduction <maximumf>, %8, %cst_8 [1] : vector<128x128xf32> to vector<128xf32>
    %10 = vector.shape_cast %9 : vector<128xf32> to vector<128x1xf32>
    %11 = vector.broadcast %10 : vector<128x1xf32> to vector<128x128xf32>
    %12 = arith.subf %8, %11 : vector<128x128xf32>
    %13 = math.exp %12 : vector<128x128xf32>
    %cst_9 = arith.constant dense<0.000000e+00> : vector<128xf32>
    %14 = vector.multi_reduction <add>, %13, %cst_9 [1] : vector<128x128xf32> to vector<128xf32>
    %15 = vector.shape_cast %14 : vector<128xf32> to vector<128x1xf32>
    %16 = vector.broadcast %15 : vector<128x1xf32> to vector<128x128xf32>
    %17 = arith.divf %13, %16 : vector<128x128xf32>
    %18 = arith.truncf %17 : vector<128x128xf32> to vector<128x128xbf16>
    %c0_10 = arith.constant 0 : index
    %c0_11 = arith.constant 0 : index
    %19 = vector.load %arg4[%c0_10, %c0_11] : memref<128x128xbf16, #tpu.memory_space<vmem>>, vector<128x128xbf16>
    %cst_12 = arith.constant dense<0.000000e+00> : vector<128x128xf32>
    %20 = tpu.matmul %18, %19, %cst_12 {dimension_numbers = #tpu.dot_dimension_numbers<[1], [0], [0], [1], [0, 0, 1, 1], [], []>} : vector<128x128xbf16>, vector<128x128xbf16>, vector<128x128xf32> -> vector<128x128xf32>
    %21 = arith.truncf %20 : vector<128x128xf32> to vector<128x128xbf16>
    %c0_13 = arith.constant 0 : index
    %c0_14 = arith.constant 0 : index
    %22 = vector.load %arg5[%c0_13, %c0_14] : memref<128x128xbf16, #tpu.memory_space<vmem>>, vector<128x128xbf16>
    %cst_15 = arith.constant dense<0.000000e+00> : vector<128x128xf32>
    %23 = tpu.matmul %21, %22, %cst_15 {dimension_numbers = #tpu.dot_dimension_numbers<[1], [0], [0], [1], [0, 0, 1, 1], [], []>} : vector<128x128xbf16>, vector<128x128xbf16>, vector<128x128xf32> -> vector<128x128xf32>
    %c0_16 = arith.constant 0 : index
    %c0_17 = arith.constant 0 : index
    %24 = vector.load %arg7[%c0_16, %c0_17] : memref<128x128xf32, #tpu.memory_space<vmem>>, vector<128x128xf32>
    tpu.vector_store %arg7[%c0_16, %c0_17], %23 {strides = array<i32>} : memref<128x128xf32, #tpu.memory_space<vmem>>, vector<128x128xf32>,
    %c0_18 = arith.constant 0 : index
    %c0_19 = arith.constant 0 : index
    %25 = vector.load %arg8[%c0_18, %c0_19] : memref<128x128xf32, #tpu.memory_space<vmem>>, vector<128x128xf32>
    tpu.vector_store %arg8[%c0_18, %c0_19], %17 {strides = array<i32>} : memref<128x128xf32, #tpu.memory_space<vmem>>, vector<128x128xf32>,
    return
  }
  func.func @transform_0(%arg0: i32) -> (i32, i32) {
    %c0_i32 = arith.constant 0 : i32
    %c0_i32_0 = arith.constant 0 : i32
    return %arg0, %c0_i32 : i32, i32
  }
  func.func @transform_1(%arg0: i32) -> (i32, i32) {
    %c0_i32 = arith.constant 0 : i32
    %c0_i32_0 = arith.constant 0 : i32
    %c0_i32_1 = arith.constant 0 : i32
    return %c0_i32, %c0_i32_0 : i32, i32
  }
  func.func @transform_2(%arg0: i32) -> (i32, i32) {
    %c0_i32 = arith.constant 0 : i32
    %c0_i32_0 = arith.constant 0 : i32
    %c0_i32_1 = arith.constant 0 : i32
    return %c0_i32, %c0_i32_0 : i32, i32
  }
  func.func @transform_3(%arg0: i32) -> (i32, i32) {
    %c0_i32 = arith.constant 0 : i32
    %c0_i32_0 = arith.constant 0 : i32
    %c0_i32_1 = arith.constant 0 : i32
    return %c0_i32, %c0_i32_0 : i32, i32
  }
  func.func @transform_4(%arg0: i32) -> (i32, i32) {
    %c0_i32 = arith.constant 0 : i32
    %c0_i32_0 = arith.constant 0 : i32
    %c0_i32_1 = arith.constant 0 : i32
    return %c0_i32, %c0_i32_0 : i32, i32
  }
  func.func @transform_5(%arg0: i32) -> (i32, i32) {
    %c0_i32 = arith.constant 0 : i32
    %c0_i32_0 = arith.constant 0 : i32
    %c0_i32_1 = arith.constant 0 : i32
    return %c0_i32, %c0_i32_0 : i32, i32
  }
  func.func @transform_6(%arg0: i32) -> (i32, i32) {
    %c0_i32 = arith.constant 0 : i32
    %c0_i32_0 = arith.constant 0 : i32
    return %arg0, %c0_i32 : i32, i32
  }
  func.func @transform_7(%arg0: i32) -> (i32, i32) {
    %c0_i32 = arith.constant 0 : i32
    %c0_i32_0 = arith.constant 0 : i32
    return %arg0, %c0_i32 : i32, i32
  }
}

module attributes {stable_mosaic.version = 11 : i64} {
  func.func @_attention_kernel(%arg0: i32, %arg1: memref<128x128xbf16, #tpu.memory_space<vmem>>, %arg2: memref<128x128xbf16, #tpu.memory_space<vmem>>, %arg3: memref<128x128xbf16, #tpu.memory_space<vmem>>, %arg4: memref<128x128xbf16, #tpu.memory_space<vmem>>, %arg5: memref<128x128xbf16, #tpu.memory_space<vmem>>, %arg6: memref<1x128xf32, #tpu.memory_space<vmem>>, %arg7: memref<128x128xf32, #tpu.memory_space<vmem>>, %arg8: memref<128x128xf32, #tpu.memory_space<vmem>>) attributes {dimension_semantics = [#tpu.dimension_semantics<parallel>], iteration_bounds = array<i64: 1>, scalar_prefetch = 0 : i64, scratch_operands = 0 : i64, tpu.core_type = #tpu.core_type<tc>, window_params = [{transform_indices = @transform_0, window_bounds = array<i64: 128, 128>}, {pipeline_mode = #tpu.pipeline_mode<synchronous>, transform_indices = @transform_1, window_bounds = array<i64: 128, 128>}, {pipeline_mode = #tpu.pipeline_mode<synchronous>, transform_indices = @transform_2, window_bounds = array<i64: 128, 128>}, {pipeline_mode = #tpu.pipeline_mode<synchronous>, transform_indices = @transform_3, window_bounds = array<i64: 128, 128>}, {pipeline_mode = #tpu.pipeline_mode<synchronous>, transform_indices = @transform_4, window_bounds = array<i64: 128, 128>}, {pipeline_mode = #tpu.pipeline_mode<synchronous>, transform_indices = @transform_5, window_bounds = array<i64: 1, 128>}, {transform_indices = @transform_6, window_bounds = array<i64: 128, 128>}, {transform_indices = @transform_7, window_bounds = array<i64: 128, 128>}]} {
    %c0 = arith.constant 0 : index
    %c0_0 = arith.constant 0 : index
    %0 = vector.load %arg1[%c0, %c0_0] : memref<128x128xbf16, #tpu.memory_space<vmem>>, vector<128x128xbf16>
    %c0_1 = arith.constant 0 : index
    %c0_2 = arith.constant 0 : index
    %1 = vector.load %arg2[%c0_1, %c0_2] : memref<128x128xbf16, #tpu.memory_space<vmem>>, vector<128x128xbf16>
    %cst = arith.constant dense<0.000000e+00> : vector<128x128xf32>
    %2 = tpu.matmul %0, %1, %cst {dimension_numbers = #tpu.dot_dimension_numbers<[1], [0], [0], [1], [0, 0, 1, 1], [], []>} : vector<128x128xbf16>, vector<128x128xbf16>, vector<128x128xf32> -> vector<128x128xf32>
    %3 = arith.truncf %2 : vector<128x128xf32> to vector<128x128xbf16>
    %c0_3 = arith.constant 0 : index
    %c0_4 = arith.constant 0 : index
    %4 = vector.load %arg3[%c0_3, %c0_4] : memref<128x128xbf16, #tpu.memory_space<vmem>>, vector<128x128xbf16>
    %cst_5 = arith.constant dense<0.000000e+00> : vector<128x128xf32>
    %5 = tpu.matmul %3, %4, %cst_5 {dimension_numbers = #tpu.dot_dimension_numbers<[1], [1], [0], [0], [0, 0, 1, 0], [], []>} : vector<128x128xbf16>, vector<128x128xbf16>, vector<128x128xf32> -> vector<128x128xf32>
    %c0_6 = arith.constant 0 : index
    %c0_7 = arith.constant 0 : index
    %6 = vector.load %arg6[%c0_6, %c0_7] : memref<1x128xf32, #tpu.memory_space<vmem>>, vector<1x128xf32>
    %7 = vector.broadcast %6 : vector<1x128xf32> to vector<128x128xf32>
    %8 = arith.addf %5, %7 : vector<128x128xf32>
    %cst_8 = arith.constant dense<0xFF800000> : vector<128xf32>
    %9 = vector.multi_reduction <maximumf>, %8, %cst_8 [1] : vector<128x128xf32> to vector<128xf32>
    %10 = vector.shape_cast %9 : vector<128xf32> to vector<128x1xf32>
    %11 = vector.broadcast %10 : vector<128x1xf32> to vector<128x128xf32>
    %12 = arith.subf %8, %11 : vector<128x128xf32>
    %13 = math.exp %12 : vector<128x128xf32>
    %cst_9 = arith.constant dense<0.000000e+00> : vector<128xf32>
    %14 = vector.multi_reduction <add>, %13, %cst_9 [1] : vector<128x128xf32> to vector<128xf32>
    %15 = vector.shape_cast %14 : vector<128xf32> to vector<128x1xf32>
    %16 = vector.broadcast %15 : vector<128x1xf32> to vector<128x128xf32>
    %17 = arith.divf %13, %16 : vector<128x128xf32>
    %18 = arith.truncf %17 : vector<128x128xf32> to vector<128x128xbf16>
    %c0_10 = arith.constant 0 : index
    %c0_11 = arith.constant 0 : index
    %19 = vector.load %arg4[%c0_10, %c0_11] : memref<128x128xbf16, #tpu.memory_space<vmem>>, vector<128x128xbf16>
    %cst_12 = arith.constant dense<0.000000e+00> : vector<128x128xf32>
    %20 = tpu.matmul %18, %19, %cst_12 {dimension_numbers = #tpu.dot_dimension_numbers<[1], [0], [0], [1], [0, 0, 1, 1], [], []>} : vector<128x128xbf16>, vector<128x128xbf16>, vector<128x128xf32> -> vector<128x128xf32>
    %21 = arith.truncf %20 : vector<128x128xf32> to vector<128x128xbf16>
    %c0_13 = arith.constant 0 : index
    %c0_14 = arith.constant 0 : index
    %22 = vector.load %arg5[%c0_13, %c0_14] : memref<128x128xbf16, #tpu.memory_space<vmem>>, vector<128x128xbf16>
    %cst_15 = arith.constant dense<0.000000e+00> : vector<128x128xf32>
    %23 = tpu.matmul %21, %22, %cst_15 {dimension_numbers = #tpu.dot_dimension_numbers<[1], [0], [0], [1], [0, 0, 1, 1], [], []>} : vector<128x128xbf16>, vector<128x128xbf16>, vector<128x128xf32> -> vector<128x128xf32>
    %c0_16 = arith.constant 0 : index
    %c0_17 = arith.constant 0 : index
    %24 = vector.load %arg7[%c0_16, %c0_17] : memref<128x128xf32, #tpu.memory_space<vmem>>, vector<128x128xf32>
    tpu.vector_store %arg7[%c0_16, %c0_17], %23 {strides = array<i32>} : memref<128x128xf32, #tpu.memory_space<vmem>>, vector<128x128xf32>,
    %c0_18 = arith.constant 0 : index
    %c0_19 = arith.constant 0 : index
    %25 = vector.load %arg8[%c0_18, %c0_19] : memref<128x128xf32, #tpu.memory_space<vmem>>, vector<128x128xf32>
    tpu.vector_store %arg8[%c0_18, %c0_19], %17 {strides = array<i32>} : memref<128x128xf32, #tpu.memory_space<vmem>>, vector<128x128xf32>,
    return
  }
  func.func @transform_0(%arg0: i32) -> (i32, i32) {
    %c0_i32 = arith.constant 0 : i32
    %c0_i32_0 = arith.constant 0 : i32
    return %arg0, %c0_i32 : i32, i32
  }
  func.func @transform_1(%arg0: i32) -> (i32, i32) {
    %c0_i32 = arith.constant 0 : i32
    %c0_i32_0 = arith.constant 0 : i32
    %c0_i32_1 = arith.constant 0 : i32
    return %c0_i32, %c0_i32_0 : i32, i32
  }
  func.func @transform_2(%arg0: i32) -> (i32, i32) {
    %c0_i32 = arith.constant 0 : i32
    %c0_i32_0 = arith.constant 0 : i32
    %c0_i32_1 = arith.constant 0 : i32
    return %c0_i32, %c0_i32_0 : i32, i32
  }
  func.func @transform_3(%arg0: i32) -> (i32, i32) {
    %c0_i32 = arith.constant 0 : i32
    %c0_i32_0 = arith.constant 0 : i32
    %c0_i32_1 = arith.constant 0 : i32
    return %c0_i32, %c0_i32_0 : i32, i32
  }
  func.func @transform_4(%arg0: i32) -> (i32, i32) {
    %c0_i32 = arith.constant 0 : i32
    %c0_i32_0 = arith.constant 0 : i32
    %c0_i32_1 = arith.constant 0 : i32
    return %c0_i32, %c0_i32_0 : i32, i32
  }
  func.func @transform_5(%arg0: i32) -> (i32, i32) {
    %c0_i32 = arith.constant 0 : i32
    %c0_i32_0 = arith.constant 0 : i32
    %c0_i32_1 = arith.constant 0 : i32
    return %c0_i32, %c0_i32_0 : i32, i32
  }
  func.func @transform_6(%arg0: i32) -> (i32, i32) {
    %c0_i32 = arith.constant 0 : i32
    %c0_i32_0 = arith.constant 0 : i32
    return %arg0, %c0_i32 : i32, i32
  }
  func.func @transform_7(%arg0: i32) -> (i32, i32) {
    %c0_i32 = arith.constant 0 : i32
    %c0_i32_0 = arith.constant 0 : i32
    return %arg0, %c0_i32 : i32, i32
  }
}

</mosaic_0001>

<bundles_post_ra>
// kernel: tpu_custom_call.1
= control target key start
LH: loop header
LB: loop body
LE: loop exit
PB: predicated region body
PF: predicated region fallthrough
CT: control target
= control target key end

     0   :  { %13 = vsyncpa [#allocation3], 0  ;;  %s1727_s0 = inlined_call_operand.hbm [shape: bf16[128,128], index: 0, kind: input, shape index: {}]   ;;  %s1728_s1 = inlined_call_operand.hbm [shape: bf16[128,128], index: 1, kind: input, shape index: {}]   ;;  %s1729_s2 = inlined_call_operand.hbm [shape: bf16[128,128], index: 2, kind: input, shape index: {}]   ;;  %s1730_s3 = inlined_call_operand.hbm [shape: bf16[128,128], index: 3, kind: input, shape index: {}]   ;;  %s1731_s4 = inlined_call_operand.hbm [shape: bf16[128,128], index: 4, kind: input, shape index: {}]   ;;  %s1732_s5 = inlined_call_operand.vmem [shape: f32[1,128], index: 5, kind: input, shape index: {}]   ;;  %s1733_s6 = inlined_call_operand.hbm [shape: f32[128,128], index: 6, kind: output, shape index: {0}]   ;;  %s1734_s7 = inlined_call_operand.hbm [shape: f32[128,128], index: 7, kind: output, shape index: {1}]  }
   0x1   :  { %14 = vsyncpa [#allocation6], 0 }
   0x2   :  { %15 = vsyncpa [#allocation9], 0 }
   0x3   :  { %16 = vsyncpa [#allocation4], 0 }
   0x4   :  { %17 = vsyncpa [#allocation13], 0  ;;  %s35_s26 = sshll.u32 %s1728_s1, 4  ;;  %s1534_s27 = smov [#allocation5]   ;;  %s36_s26 = int_to_ptr.hbm [resolvable:$true] %s35_s26 }
   0x5   :  { %s37_s28 = sshll.u32 %s1534_s27, 4  ;;  %s61_s8 = sshll.u32 %s1730_s3, 4  ;;  %s38_s28 = int_to_ptr.vmem [resolvable:$true] %s37_s28  ;;  %s62_s8 = int_to_ptr.hbm [resolvable:$true] %s61_s8 }
   0x6   :  { %s1535_s9 = smov 64   ;;  %s1536_s10 = smov 4  }
   0x7   :  { %43 = dma.hbm_to_vmem [thread:$0]  %s36_s26, 1024, %s38_s28, [#allocation6], %s1535_s9, %s1535_s9, %s1536_s10  }
   0x8   :  { %s1537_s11 = smov [#allocation8]   ;;  %s22_s15 = sshll.u32 %s1727_s0, 4  ;;  %s23_s15 = int_to_ptr.hbm [resolvable:$true] %s22_s15 }
   0x9   :  { %s63_s12 = sshll.u32 %s1537_s11, 4  ;;  %s48_s17 = sshll.u32 %s1729_s2, 4  ;;  %s64_s12 = int_to_ptr.vmem [resolvable:$true] %s63_s12  ;;  %s49_s17 = int_to_ptr.hbm [resolvable:$true] %s48_s17 }
   0xa   :  { %69 = dma.hbm_to_vmem [thread:$0]  %s62_s8, 1024, %s64_s12, [#allocation9], %s1535_s9, %s1535_s9, %s1536_s10  }
   0xb   :  { %s1538_s18 = smov [#allocation2]   ;;  %s1539_s3 = smov [#allocation7]  }
   0xc   :  { %s24_s19 = sshll.u32 %s1538_s18, 4  ;;  %s50_s20 = sshll.u32 %s1539_s3, 4  ;;  %s25_s19 = int_to_ptr.vmem [resolvable:$true] %s24_s19  ;;  %s51_s20 = int_to_ptr.vmem [resolvable:$true] %s50_s20 }
   0xd   :  { %30 = dma.hbm_to_vmem [thread:$0]  %s23_s15, 1024, %s25_s19, [#allocation3], %s1535_s9, %s1535_s9, %s1536_s10  }
   0xe   :  { %s74_s23 = sshll.u32 %s1731_s4, 4  ;;  %s1540_s0 = smov [#allocation10]   ;;  %s75_s23 = int_to_ptr.hbm [resolvable:$true] %s74_s23 }
   0xf   :  { %56 = dma.hbm_to_vmem [thread:$0]  %s49_s17, 1024, %s51_s20, [#allocation6], %s1535_s9, %s1535_s9, %s1536_s10  }
  0x10   :  { %s76_s24 = sshll.u32 %s1540_s0, 4  ;;  %s77_s24 = int_to_ptr.vmem [resolvable:$true] %s76_s24 }
  0x11   :  { %82 = dma.hbm_to_vmem [thread:$0]  %s75_s23, 1024, %s77_s24, [#allocation9], %s1535_s9, %s1535_s9, %s1536_s10  }
  0x12   :  { %1524 = dma.done.wait [#allocation3], 1024  }
  0x13   :  { %1525 = vsyncadd [#allocation3], 4294966272 }
  0x14   :  { %1526 = dma.done.wait [#allocation6], 2048  }
  0x15   :  { %1527 = vsyncadd [#allocation6], 4294965248 }
  0x16   :  { %1528 = dma.done.wait [#allocation9], 2048  }
  0x17   :  { %1529 = vsyncadd [#allocation9], 4294965248  ;;  %v1247_v0 = vld [vmem:[#allocation5 + $0x38] sm:$0xff]  ;;  %v1246_v1 = vld [vmem:[#allocation5 + $0x30] sm:$0xff]  ;;  %s1052_s28 = sshll.u32 %s1734_s7, 4  ;;  %s1542_s29 = smov 128   ;;  %s1053_s28 = int_to_ptr.hbm [resolvable:$true] %s1052_s28 }
  0x18   :  { %233 = vmatpush.bf16.msra.mxu0 %v1247_v0  ;;  %v1255_v2 = vld [vmem:[#allocation7 + $0x38] sm:$0xff]  ;;  %v1245_v3 = vld [vmem:[#allocation5 + $0x28] sm:$0xff]  ;;  %v1244_v4 = vld [vmem:[#allocation5 + $0x20] sm:$0xff]  ;;  %s1543_s30 = smov 8   ;;  %s1544_s7 = smov [#allocation11]  }
  0x19   :  { %1272 = vmatpush.bf16.xpose.msra.mxu1 %v1255_v2  ;;  %v1243_v5 = vld [vmem:[#allocation5 + $0x18] sm:$0xff]  ;;  %v1254_v6 = vld [vmem:[#allocation7 + $0x30] sm:$0xff]  ;;  %v1241_v8 = vld [vmem:[#allocation5 + $0x8] sm:$0xff]  ;;  %s1037_s8 = sshll.u32 %s1544_s7, 4  ;;  %s1039_s11 = sshll.u32 %s1733_s6, 4  ;;  %s1038_s8 = int_to_ptr.vmem [resolvable:$true] %s1037_s8  ;;  %s1040_s11 = int_to_ptr.hbm [resolvable:$true] %s1039_s11 }
  0x1a   :  { %v1242_v7 = vld [vmem:[#allocation5 + $0x10] sm:$0xff]  ;;  %v1240_v9 = vld [vmem:[#allocation5] sm:$0xff]  ;;  %v1253_v11 = vld [vmem:[#allocation7 + $0x28] sm:$0xff] }
  0x1b   :  { %v1232_v10 = vld [vmem:[#allocation2] sm:$0xff]  ;;  %v1233_v12 = vld [vmem:[#allocation2 + $0x8] sm:$0xff]  ;;  %v1234_v14 = vld [vmem:[#allocation2 + $0x10] sm:$0xff] }
  0x1c   :  { %234 = vmatpush.bf16.msra.mxu0 %v1246_v1  ;;  %v1252_v13 = vld [vmem:[#allocation7 + $0x20] sm:$0xff]  ;;  %v1251_v15 = vld [vmem:[#allocation7 + $0x18] sm:$0xff]  ;;  %v1250_v17 = vld [vmem:[#allocation7 + $0x10] sm:$0xff] }
  0x1d   :  { %v1235_v16 = vld [vmem:[#allocation2 + $0x18] sm:$0xff]  ;;  %v1236_v18 = vld [vmem:[#allocation2 + $0x20] sm:$0xff]  ;;  %v1249_v19 = vld [vmem:[#allocation7 + $0x8] sm:$0xff] }
  0x1e   :  { %v1237_v20 = vld [vmem:[#allocation2 + $0x28] sm:$0xff]  ;;  %v1248_v21 = vld [vmem:[#allocation7] sm:$0xff]  ;;  %v1238_v22 = vld [vmem:[#allocation2 + $0x30] sm:$0xff] }
  0x1f   :  { %v1239_v23 = vld [vmem:[#allocation2 + $0x38] sm:$0xff]  ;;  %v1603_v48 = vld [vmem:[%s1732_s5] ss:$0 sm:$0xff]  ;;  %s1541_s5 = smov [#allocation12]  }
  0x20   :  { %235 = vmatpush.bf16.msra.mxu0 %v1245_v3  ;;  %s1050_s25 = sshll.u32 %s1541_s5, 4  ;;  %s1051_s25 = int_to_ptr.vmem [resolvable:$true] %s1050_s25 }
  0x21   :  { %1273 = vmatpush.bf16.xpose.msra.mxu1 %v1254_v6 }
  0x24   :  { %236 = vmatpush.bf16.msra.mxu0 %v1244_v4 }
  0x28   :  { %237 = vmatpush.bf16.msra.mxu0 %v1243_v5 }
  0x29   :  { %1274 = vmatpush.bf16.xpose.msra.mxu1 %v1253_v11 }
  0x2c   :  { %238 = vmatpush.bf16.msra.mxu0 %v1242_v7 }
  0x30   :  { %239 = vmatpush.bf16.msra.mxu0 %v1241_v8 }
  0x31   :  { %1275 = vmatpush.bf16.xpose.msra.mxu1 %v1252_v13 }
  0x34   :  { %240 = vmatpush.bf16.msra.mxu0 %v1240_v9 }
  0x37   :  { %241 = vmatmul.bf16.vlgmr.msra.gmra.mxu0 %v1232_v10 }
  0x38   :  { %358 = vmatpush.bf16.xpose.msrb.mxu0 %v1255_v2 }
  0x39   :  { %1276 = vmatpush.bf16.xpose.msra.mxu1 %v1251_v15 }
  0x40   :  { %359 = vmatpush.bf16.xpose.msrb.mxu0 %v1254_v6 }
  0x41   :  { %1277 = vmatpush.bf16.xpose.msra.mxu1 %v1250_v17 }
  0x47   :  { %246 = vmatmul.bf16.gmra.mxu0 %v1233_v12 }
  0x48   :  { %360 = vmatpush.bf16.xpose.msrb.mxu0 %v1253_v11 }
  0x49   :  { %1278 = vmatpush.bf16.xpose.msra.mxu1 %v1249_v19 }
  0x50   :  { %361 = vmatpush.bf16.xpose.msrb.mxu0 %v1252_v13 }
  0x51   :  { %1279 = vmatpush.bf16.xpose.msra.mxu1 %v1248_v21 }
  0x57   :  { %251 = vmatmul.bf16.gmra.mxu0 %v1234_v14 }
  0x58   :  { %362 = vmatpush.bf16.xpose.msrb.mxu0 %v1251_v15 }
  0x60   :  { %363 = vmatpush.bf16.xpose.msrb.mxu0 %v1250_v17 }
  0x67   :  { %256 = vmatmul.bf16.gmra.mxu0 %v1235_v16 }
  0x68   :  { %364 = vmatpush.bf16.xpose.msrb.mxu0 %v1249_v19 }
  0x70   :  { %365 = vmatpush.bf16.xpose.msrb.mxu0 %v1248_v21 }
  0x77   :  { %261 = vmatmul.bf16.gmra.mxu0 %v1236_v18 }
  0x87   :  { %266 = vmatmul.bf16.gmra.mxu0 %v1237_v20 }
  0x97   :  { %271 = vmatmul.bf16.gmra.mxu0 %v1238_v22 }
  0xa7   :  { %276 = vmatmul.bf16.gmra.mxu0 %v1239_v23 }
  0xb4   :  { %v242_v24 = vpop.f32.mrf.mxu0 }
  0xbc   :  { %v244_v25 = vpop.f32.mrf.mxu0 }
  0xbd   :  { %v282_v26 = vpack.c.bf16 %v244_v25, %v242_v24 }
  0xbf   :  { %366 = vmatmul.bf16.vlgmr.msrb.gmra.mxu0 %v282_v26 }
  0xc4   :  { %v247_v27 = vpop.f32.mrf.mxu0 }
  0xcc   :  { %v249_v28 = vpop.f32.mrf.mxu0 }
  0xcd   :  { %v283_v29 = vpack.c.bf16 %v249_v28, %v247_v27 }
  0xcf   :  { %371 = vmatmul.bf16.vlgmr.msra.gmra.mxu1 %v283_v29 }
  0xd4   :  { %v252_v30 = vpop.f32.mrf.mxu0 }
  0xdc   :  { %v254_v31 = vpop.f32.mrf.mxu0 }
  0xdd   :  { %v284_v32 = vpack.c.bf16 %v254_v31, %v252_v30 }
  0xdf   :  { %376 = vmatmul.bf16.gmra.mxu1 %v284_v32 }
  0xe4   :  { %v257_v33 = vpop.f32.mrf.mxu0 }
  0xec   :  { %v259_v34 = vpop.f32.mrf.mxu0 }
  0xed   :  { %v285_v35 = vpack.c.bf16 %v259_v34, %v257_v33 }
  0xef   :  { %381 = vmatmul.bf16.gmra.mxu1 %v285_v35  ;;  %v1263_v35 = vld [vmem:[#allocation8 + $0x38] sm:$0xff] }
  0xf0   :  { %831 = vmatpush.bf16.msra.mxu2 %v1263_v35 }
  0xf4   :  { %v262_v36 = vpop.f32.mrf.mxu0 }
  0xfc   :  { %v264_v37 = vpop.f32.mrf.mxu0 }
  0xfd   :  { %v286_v38 = vpack.c.bf16 %v264_v37, %v262_v36 }
  0xff   :  { %386 = vmatmul.bf16.gmra.mxu1 %v286_v38 }
 0x104   :  { %v267_v39 = vpop.f32.mrf.mxu0 }
 0x10c   :  { %v269_v40 = vpop.f32.mrf.mxu0 }
 0x10d   :  { %v287_v41 = vpack.c.bf16 %v269_v40, %v267_v39 }
 0x10f   :  { %391 = vmatmul.bf16.gmra.mxu1 %v287_v41 }
 0x114   :  { %v272_v42 = vpop.f32.mrf.mxu0 }
 0x11c   :  { %v274_v43 = vpop.f32.mrf.mxu0 }
 0x11d   :  { %v288_v44 = vpack.c.bf16 %v274_v43, %v272_v42 }
 0x11f   :  { %396 = vmatmul.bf16.gmra.mxu1 %v288_v44 }
 0x124   :  { %v277_v45 = vpop.f32.mrf.mxu0 }
 0x12c   :  { %v279_v46 = vpop.f32.mrf.mxu0 }
 0x12d   :  { %v289_v47 = vpack.c.bf16 %v279_v46, %v277_v45 }
 0x12f   :  { %401 = vmatmul.bf16.gmra.mxu1 %v289_v47 }
 0x13c   :  { %v367_v49 = vpop.f32.mrf.mxu0 }
 0x13d   :  { %v368_v50 = vadd.f32 %v1603_v48, %v367_v49 }
 0x13f   :  { %407 = vmax.xlane.f32.xlu0 %v368_v50 }
 0x144   :  { %v369_v51 = vpop.f32.mrf.mxu0 }
 0x145   :  { %v370_v52 = vadd.f32 %v1603_v48, %v369_v51 }
 0x147   :  { %409 = vmax.xlane.f32.xlu0 %v370_v52 }
 0x14c   :  { %v372_v53 = vpop.f32.mrf.mxu1 }
 0x14d   :  { %v373_v54 = vadd.f32 %v1603_v48, %v372_v53 }
 0x14f   :  { %411 = vmax.xlane.f32.xlu1 %v373_v54 }
 0x154   :  { %v374_v55 = vpop.f32.mrf.mxu1 }
 0x155   :  { %v375_v56 = vadd.f32 %v1603_v48, %v374_v55  ;;  %v1262_v55 = vld [vmem:[#allocation8 + $0x30] sm:$0xff] }
 0x156   :  { %832 = vmatpush.bf16.msra.mxu2 %v1262_v55 }
 0x157   :  { %413 = vmax.xlane.f32.xlu1 %v375_v56 }
 0x15c   :  { %v377_v57 = vpop.f32.mrf.mxu1 }
 0x15d   :  { %v378_v58 = vadd.f32 %v1603_v48, %v377_v57  ;;  %v1260_v57 = vld [vmem:[#allocation8 + $0x20] sm:$0xff] }
 0x15f   :  { %415 = vmax.xlane.f32.xlu2 %v378_v58 }
 0x164   :  { %v379_v59 = vpop.f32.mrf.mxu1 }
 0x165   :  { %v380_v60 = vadd.f32 %v1603_v48, %v379_v59  ;;  %v1257_v59 = vld [vmem:[#allocation8 + $0x8] sm:$0xff] }
 0x167   :  { %417 = vmax.xlane.f32.xlu2 %v380_v60 }
 0x16c   :  { %v382_v61 = vpop.f32.mrf.mxu1 }
 0x16d   :  { %v383_v62 = vadd.f32 %v1603_v48, %v382_v61 }
 0x16f   :  { %419 = vmax.xlane.f32.xlu0 %v383_v62 }
 0x174   :  { %v384_v63 = vpop.f32.mrf.mxu1 }
 0x175   :  { %v1613_v0 = vadd.f32 %v1603_v48, %v384_v63 }
 0x177   :  { %421 = vmax.xlane.f32.xlu1 %v1613_v0 }
 0x17c   :  { %v387_v1 = vpop.f32.mrf.mxu1 }
 0x17d   :  { %v1617_v2 = vadd.f32 %v1603_v48, %v387_v1 }
 0x17f   :  { %423 = vmax.xlane.f32.xlu1 %v1617_v2 }
 0x184   :  { %v389_v5 = vpop.f32.mrf.mxu1 }
 0x185   :  { %v1624_v14 = vadd.f32 %v1603_v48, %v389_v5 }
 0x18c   :  { %v392_v11 = vpop.f32.mrf.mxu1 }
 0x18d   :  { %v1631_v20 = vadd.f32 %v1603_v48, %v392_v11 }
 0x194   :  { %v394_v17 = vpop.f32.mrf.mxu1 }
 0x195   :  { %v1638_v26 = vadd.f32 %v1603_v48, %v394_v17 }
 0x19c   :  { %v397_v24 = vpop.f32.mrf.mxu1 }
 0x19d   :  { %v1645_v31 = vadd.f32 %v1603_v48, %v397_v24 }
 0x1a4   :  { %v399_v33 = vpop.f32.mrf.mxu1 }
 0x1a5   :  { %v1652_v38 = vadd.f32 %v1603_v48, %v399_v33 }
 0x1ac   :  { %v402_v41 = vpop.f32.mrf.mxu1 }
 0x1ad   :  { %v1660_v44 = vadd.f32 %v1603_v48, %v402_v41 }
 0x1b2   :  { %v408_v3 = vpop.xlane.xlu0 %407 }
 0x1b3   :  { %v439_v4 = vsub.f32 %v368_v50, %v408_v3 }
 0x1b4   :  { %v404_v47 = vpop.f32.mrf.mxu1 }
 0x1b5   :  { %v455_v6 = vmul.f32 1.442695, %v439_v4  ;;  %v1668_v51 = vadd.f32 %v1603_v48, %v404_v47  ;;  %v1259_v48 = vld [vmem:[#allocation8 + $0x18] sm:$0xff] }
 0x1b7   :  { %1292 = vpow2.f32 %v455_v6 }
 0x1ba   :  { %v410_v7 = vpop.xlane.xlu0 %409 }
 0x1bb   :  { %v440_v8 = vsub.f32 %v370_v52, %v410_v7 }
 0x1bd   :  { %v1620_v9 = vpop.eup %1292  ;;  %v457_v10 = vmul.f32 1.442695, %v440_v8 }
 0x1be   :  { %487 = vadd.xlane.f32.xlu2 %v1620_v9 }
 0x1bf   :  { %1294 = vpow2.f32 %v457_v10 }
 0x1c2   :  { %v412_v12 = vpop.xlane.xlu1 %411 }
 0x1c3   :  { %v441_v13 = vsub.f32 %v373_v54, %v412_v12 }
 0x1c5   :  { %v1626_v15 = vpop.eup %1294  ;;  %v459_v16 = vmul.f32 1.442695, %v441_v13 }
 0x1c6   :  { %425 = vmax.xlane.f32.xlu2 %v1624_v14  ;;  %489 = vadd.xlane.f32.xlu0 %v1626_v15 }
 0x1c7   :  { %1296 = vpow2.f32 %v459_v16 }
 0x1ca   :  { %v414_v18 = vpop.xlane.xlu1 %413 }
 0x1cb   :  { %v442_v19 = vsub.f32 %v375_v56, %v414_v18  ;;  %v1261_v56 = vld [vmem:[#allocation8 + $0x28] sm:$0xff] }
 0x1cc   :  { %833 = vmatpush.bf16.msra.mxu2 %v1261_v56 }
 0x1cd   :  { %v1633_v21 = vpop.eup %1296  ;;  %v461_v22 = vmul.f32 1.442695, %v442_v19 }
 0x1ce   :  { %427 = vmax.xlane.f32.xlu2 %v1631_v20  ;;  %491 = vadd.xlane.f32.xlu0 %v1633_v21 }
 0x1cf   :  { %1298 = vpow2.f32 %v461_v22 }
 0x1d0   :  { %834 = vmatpush.bf16.msra.mxu2 %v1260_v57 }
 0x1d2   :  { %v416_v23 = vpop.xlane.xlu2 %415 }
 0x1d3   :  { %v443_v25 = vsub.f32 %v378_v58, %v416_v23  ;;  %v1258_v58 = vld [vmem:[#allocation8 + $0x10] sm:$0xff] }
 0x1d4   :  { %835 = vmatpush.bf16.msra.mxu2 %v1259_v48 }
 0x1d5   :  { %v1640_v27 = vpop.eup %1298  ;;  %v463_v28 = vmul.f32 1.442695, %v443_v25 }
 0x1d6   :  { %493 = vadd.xlane.f32.xlu1 %v1640_v27  ;;  %429 = vmax.xlane.f32.xlu0 %v1638_v26 }
 0x1d7   :  { %1300 = vpow2.f32 %v463_v28 }
 0x1d8   :  { %836 = vmatpush.bf16.msra.mxu2 %v1258_v58 }
 0x1da   :  { %v418_v29 = vpop.xlane.xlu2 %417 }
 0x1db   :  { %v444_v30 = vsub.f32 %v380_v60, %v418_v29  ;;  %v1256_v60 = vld [vmem:[#allocation8] sm:$0xff] }
 0x1dc   :  { %837 = vmatpush.bf16.msra.mxu2 %v1257_v59 }
 0x1dd   :  { %v1647_v32 = vpop.eup %1300  ;;  %v465_v34 = vmul.f32 1.442695, %v444_v30 }
 0x1de   :  { %495 = vadd.xlane.f32.xlu1 %v1647_v32  ;;  %431 = vmax.xlane.f32.xlu0 %v1645_v31 }
 0x1df   :  { %1302 = vpow2.f32 %v465_v34 }
 0x1e0   :  { %838 = vmatpush.bf16.msra.mxu2 %v1256_v60 }
 0x1e2   :  { %v420_v36 = vpop.xlane.xlu0 %419 }
 0x1e3   :  { %v445_v37 = vsub.f32 %v383_v62, %v420_v36 }
 0x1e5   :  { %v1654_v39 = vpop.eup %1302  ;;  %v467_v40 = vmul.f32 1.442695, %v445_v37 }
 0x1e6   :  { %433 = vmax.xlane.f32.xlu1 %v1652_v38  ;;  %497 = vadd.xlane.f32.xlu2 %v1654_v39 }
 0x1e7   :  { %1304 = vpow2.f32 %v467_v40 }
 0x1ea   :  { %v422_v42 = vpop.xlane.xlu1 %421 }
 0x1eb   :  { %v446_v43 = vsub.f32 %v1613_v0, %v422_v42 }
 0x1ed   :  { %v1662_v45 = vpop.eup %1304  ;;  %v469_v46 = vmul.f32 1.442695, %v446_v43 }
 0x1ee   :  { %499 = vadd.xlane.f32.xlu2 %v1662_v45  ;;  %435 = vmax.xlane.f32.xlu1 %v1660_v44 }
 0x1ef   :  { %1306 = vpow2.f32 %v469_v46 }
 0x1f2   :  { %v424_v49 = vpop.xlane.xlu1 %423 }
 0x1f3   :  { %v447_v50 = vsub.f32 %v1617_v2, %v424_v49 }
 0x1f5   :  { %v1670_v52 = vpop.eup %1306  ;;  %v471_v53 = vmul.f32 1.442695, %v447_v50 }
 0x1f6   :  { %501 = vadd.xlane.f32.xlu0 %v1670_v52  ;;  %437 = vmax.xlane.f32.xlu2 %v1668_v51 }
 0x1f7   :  { %1308 = vpow2.f32 %v471_v53 }
 0x1fd   :  { %v1674_v54 = vpop.eup %1308 }
 0x1fe   :  { %503 = vadd.xlane.f32.xlu0 %v1674_v54 }
 0x231   :  { %v488_v61 = vpop.xlane.xlu2 %487 }
 0x232   :  { %1310 = vrcp.f32 %v488_v61  ;;  %v530_v6 = vand.u32 2147483648, %v488_v61  ;;  %v528_v7 = vand.u32 2147483647, %v488_v61  ;;  %vm524_vm1 = vweird.f32 %v488_v61 }
 0x234   :  { %v531_v17 = vor.u32 1.1754944e-38, %v530_v6  ;;  %vm529_vm3 = vcmp.eq.f32.partialorder %v528_v7, 8.507059e+37 }
 0x238   :  { %v1311_v62 = vpop.eup %1310 }
 0x239   :  { %v520_v63 = vmul.f32 %v1311_v62, %v488_v61  ;;  %v426_v0 = vpop.xlane.xlu2 %425  ;;  %v490_v1 = vpop.xlane.xlu0 %489  ;;  %vm525_vm0 = vweird.f32 %v1311_v62 }
 0x23a   :  { %v448_v2 = vsub.f32 %v1624_v14, %v426_v0  ;;  %1312 = vrcp.f32 %v490_v1  ;;  %vm526_vm2 = vmor %vm524_vm1, %vm525_vm0  ;;  %v545_v28 = vand.u32 2147483648, %v490_v1  ;;  %v543_v29 = vand.u32 2147483647, %v490_v1 }
 0x23b   :  { %v521_v3 = vsub.f32 1.0, %v520_v63  ;;  %vm539_vm5 = vweird.f32 %v490_v1 }
 0x23c   :  { %v473_v4 = vmul.f32 1.442695, %v448_v2  ;;  %v546_v37 = vor.u32 1.1754944e-38, %v545_v28  ;;  %vm544_vm7 = vcmp.eq.f32.partialorder %v543_v29, 8.507059e+37 }
 0x23d   :  { %v522_v5 = vmul.f32 %v1311_v62, %v521_v3 }
 0x23e   :  { %1314 = vpow2.f32 %v473_v4 }
 0x23f   :  { %v523_v8 = vadd.f32 %v1311_v62, %v522_v5 }
 0x240   :  { %v1313_v10 = vpop.eup %1312 }
 0x241   :  { %v535_v11 = vmul.f32 %v1313_v10, %v490_v1  ;;  %v428_v12 = vpop.xlane.xlu2 %427  ;;  %v492_v13 = vpop.xlane.xlu0 %491  ;;  %v527_v16 = vsel %vm526_vm2, %v1311_v62, %v523_v8  ;;  %vm540_vm4 = vweird.f32 %v1313_v10 }
 0x242   :  { %v449_v18 = vsub.f32 %v1631_v20, %v428_v12  ;;  %1316 = vrcp.f32 %v492_v13  ;;  %v532_v19 = vsel %vm529_vm3, %v531_v17, %v527_v16  ;;  %vm541_vm6 = vmor %vm539_vm5, %vm540_vm4  ;;  %v560_v49 = vand.u32 2147483648, %v492_v13 }
 0x243   :  { %v536_v14 = vsub.f32 1.0, %v535_v11  ;;  %v533_v24 = vmul.f32 %v1620_v9, %v532_v19  ;;  %v558_v53 = vand.u32 2147483647, %v492_v13  ;;  %vm554_vm9 = vweird.f32 %v492_v13 }
 0x244   :  { %v1679_v22 = vpop.eup %1314  ;;  %v475_v23 = vmul.f32 1.442695, %v449_v18  ;;  %v561_v59 = vor.u32 1.1754944e-38, %v560_v49 }
 0x245   :  { %v537_v25 = vmul.f32 %v1313_v10, %v536_v14  ;;  %505 = vadd.xlane.f32.xlu1 %v1679_v22  ;;  %1017 = vst [vmem:[#allocation12] sm:$0xff] %v533_v24  ;;  %vm559_vm11 = vcmp.eq.f32.partialorder %v558_v53, 8.507059e+37 }
 0x246   :  { %1318 = vpow2.f32 %v475_v23 }
 0x247   :  { %v538_v30 = vadd.f32 %v1313_v10, %v537_v25 }
 0x248   :  { %v1317_v20 = vpop.eup %1316 }
 0x249   :  { %v550_v33 = vmul.f32 %v1317_v20, %v492_v13  ;;  %v494_v34 = vpop.xlane.xlu1 %493  ;;  %v430_v35 = vpop.xlane.xlu0 %429  ;;  %v542_v36 = vsel %vm541_vm6, %v1313_v10, %v538_v30  ;;  %vm555_vm8 = vweird.f32 %v1317_v20 }
 0x24a   :  { %1320 = vrcp.f32 %v494_v34  ;;  %v450_v9 = vsub.f32 %v1638_v26, %v430_v35  ;;  %v547_v41 = vsel %vm544_vm7, %v546_v37, %v542_v36  ;;  %vm556_vm10 = vmor %vm554_vm9, %vm555_vm8  ;;  %v575_v2 = vand.u32 2147483648, %v494_v34 }
 0x24b   :  { %v551_v40 = vsub.f32 1.0, %v550_v33  ;;  %v548_v46 = vmul.f32 %v1626_v15, %v547_v41  ;;  %v573_v3 = vand.u32 2147483647, %v494_v34  ;;  %vm569_vm13 = vweird.f32 %v494_v34 }
 0x24c   :  { %v1684_v42 = vpop.eup %1318  ;;  %v477_v43 = vmul.f32 1.442695, %v450_v9  ;;  %v576_v10 = vor.u32 1.1754944e-38, %v575_v2 }
 0x24d   :  { %v552_v47 = vmul.f32 %v1317_v20, %v551_v40  ;;  %507 = vadd.xlane.f32.xlu2 %v1684_v42  ;;  %v759_v50 = vpack.c.bf16 %v548_v46, %v533_v24  ;;  %1018 = vst [vmem:[#allocation12 + $0x8] sm:$0xff] %v548_v46  ;;  %vm574_vm15 = vcmp.eq.f32.partialorder %v573_v3, 8.507059e+37 }
 0x24e   :  { %1322 = vpow2.f32 %v477_v43 }
 0x24f   :  { %v553_v55 = vadd.f32 %v1317_v20, %v552_v47  ;;  %839 = vmatmul.bf16.vlgmr.msra.gmra.mxu2 %v759_v50 }
 0x250   :  { %v1321_v26 = vpop.eup %1320 }
 0x251   :  { %v565_v56 = vmul.f32 %v1321_v26, %v494_v34  ;;  %v496_v57 = vpop.xlane.xlu1 %495  ;;  %v432_v48 = vpop.xlane.xlu0 %431  ;;  %v557_v58 = vsel %vm556_vm10, %v1317_v20, %v553_v55  ;;  %vm570_vm12 = vweird.f32 %v1321_v26 }
 0x252   :  { %1324 = vrcp.f32 %v496_v57  ;;  %v451_v15 = vsub.f32 %v1645_v31, %v432_v48  ;;  %v562_v61 = vsel %vm559_vm11, %v561_v59, %v557_v58  ;;  %vm571_vm14 = vmor %vm569_vm13, %vm570_vm12  ;;  %v590_v14 = vand.u32 2147483648, %v496_v57 }
 0x253   :  { %v566_v60 = vsub.f32 1.0, %v565_v56  ;;  %v563_v0 = vmul.f32 %v1633_v21, %v562_v61  ;;  %v588_v23 = vand.u32 2147483647, %v496_v57  ;;  %vm584_vm1 = vweird.f32 %v496_v57 }
 0x254   :  { %v1689_v62 = vpop.eup %1322  ;;  %v479_v63 = vmul.f32 1.442695, %v451_v15  ;;  %v591_v20 = vor.u32 1.1754944e-38, %v590_v14 }
 0x255   :  { %v567_v1 = vmul.f32 %v1321_v26, %v566_v60  ;;  %509 = vadd.xlane.f32.xlu0 %v1689_v62  ;;  %1019 = vst [vmem:[#allocation12 + $0x10] sm:$0xff] %v563_v0  ;;  %vm589_vm3 = vcmp.eq.f32.partialorder %v588_v23, 8.507059e+37 }
 0x256   :  { %1326 = vpow2.f32 %v479_v63 }
 0x257   :  { %v568_v4 = vadd.f32 %v1321_v26, %v567_v1 }
 0x258   :  { %v1325_v5 = vpop.eup %1324 }
 0x259   :  { %v580_v31 = vmul.f32 %v1325_v5, %v496_v57  ;;  %v434_v6 = vpop.xlane.xlu1 %433  ;;  %v498_v7 = vpop.xlane.xlu2 %497  ;;  %v572_v8 = vsel %vm571_vm14, %v1321_v26, %v568_v4  ;;  %vm585_vm0 = vweird.f32 %v1325_v5 }
 0x25a   :  { %v452_v11 = vsub.f32 %v1652_v38, %v434_v6  ;;  %1328 = vrcp.f32 %v498_v7  ;;  %v577_v12 = vsel %vm574_vm15, %v576_v10, %v572_v8  ;;  %vm586_vm2 = vmor %vm584_vm1, %vm585_vm0  ;;  %v605_v40 = vand.u32 2147483648, %v498_v7 }
 0x25b   :  { %v581_v21 = vsub.f32 1.0, %v580_v31  ;;  %v578_v17 = vmul.f32 %v1640_v27, %v577_v12  ;;  %v603_v41 = vand.u32 2147483647, %v498_v7  ;;  %vm599_vm5 = vweird.f32 %v498_v7 }
 0x25c   :  { %v1694_v13 = vpop.eup %1326  ;;  %v481_v16 = vmul.f32 1.442695, %v452_v11  ;;  %v606_v53 = vor.u32 1.1754944e-38, %v605_v40 }
 0x25d   :  { %v582_v18 = vmul.f32 %v1325_v5, %v581_v21  ;;  %511 = vadd.xlane.f32.xlu1 %v1694_v13  ;;  %v760_v19 = vpack.c.bf16 %v578_v17, %v563_v0  ;;  %1020 = vst [vmem:[#allocation12 + $0x18] sm:$0xff] %v578_v17  ;;  %vm604_vm7 = vcmp.eq.f32.partialorder %v603_v41, 8.507059e+37 }
 0x25e   :  { %1330 = vpow2.f32 %v481_v16 }
 0x25f   :  { %v583_v38 = vadd.f32 %v1325_v5, %v582_v18  ;;  %844 = vmatmul.bf16.gmra.mxu2 %v760_v19 }
 0x260   :  { %v1329_v24 = vpop.eup %1328 }
 0x261   :  { %v595_v25 = vmul.f32 %v1329_v24, %v498_v7  ;;  %v500_v28 = vpop.xlane.xlu2 %499  ;;  %v436_v29 = vpop.xlane.xlu1 %435  ;;  %v587_v30 = vsel %vm586_vm2, %v1325_v5, %v583_v38  ;;  %vm600_vm4 = vweird.f32 %v1329_v24 }
 0x262   :  { %1332 = vrcp.f32 %v500_v28  ;;  %v453_v27 = vsub.f32 %v1660_v44, %v436_v29  ;;  %v592_v34 = vsel %vm589_vm3, %v591_v20, %v587_v30  ;;  %vm601_vm6 = vmor %vm599_vm5, %vm600_vm4  ;;  %v620_v57 = vand.u32 2147483648, %v500_v28  ;;  %v1271_v30 = vld [vmem:[#allocation10 + $0x38] sm:$0xff]  ;;  %v1269_v20 = vld [vmem:[#allocation10 + $0x28] sm:$0xff] }
 0x263   :  { %v596_v33 = vsub.f32 1.0, %v595_v25  ;;  %v593_v37 = vmul.f32 %v1647_v32, %v592_v34  ;;  %v618_v15 = vand.u32 2147483647, %v500_v28  ;;  %vm614_vm9 = vweird.f32 %v500_v28  ;;  %952 = vmatpush.bf16.msra.mxu3 %v1271_v30  ;;  %v1266_v34 = vld [vmem:[#allocation10 + $0x10] sm:$0xff] }
 0x264   :  { %v1699_v35 = vpop.eup %1330  ;;  %v483_v36 = vmul.f32 1.442695, %v453_v27  ;;  %v621_v63 = vor.u32 1.1754944e-38, %v620_v57  ;;  %v1268_v27 = vld [vmem:[#allocation10 + $0x20] sm:$0xff] }
 0x265   :  { %v597_v9 = vmul.f32 %v1329_v24, %v596_v33  ;;  %513 = vadd.xlane.f32.xlu2 %v1699_v35  ;;  %1021 = vst [vmem:[#allocation12 + $0x20] sm:$0xff] %v593_v37  ;;  %vm619_vm11 = vcmp.eq.f32.partialorder %v618_v15, 8.507059e+37  ;;  %v1267_v33 = vld [vmem:[#allocation10 + $0x18] sm:$0xff] }
 0x266   :  { %1334 = vpow2.f32 %v483_v36  ;;  %v1265_v36 = vld [vmem:[#allocation10 + $0x8] sm:$0xff] }
 0x267   :  { %v598_v43 = vadd.f32 %v1329_v24, %v597_v9  ;;  %v1264_v9 = vld [vmem:[#allocation10] sm:$0xff] }
 0x268   :  { %v1333_v46 = vpop.eup %1332 }
 0x269   :  { %v610_v44 = vmul.f32 %v1333_v46, %v500_v28  ;;  %v502_v47 = vpop.xlane.xlu0 %501  ;;  %v438_v49 = vpop.xlane.xlu2 %437  ;;  %v602_v50 = vsel %vm601_vm6, %v1329_v24, %v598_v43  ;;  %vm615_vm8 = vweird.f32 %v1333_v46 }
 0x26a   :  { %1336 = vrcp.f32 %v502_v47  ;;  %v454_v32 = vsub.f32 %v1668_v51, %v438_v49  ;;  %v607_v26 = vsel %vm604_vm7, %v606_v53, %v602_v50  ;;  %vm616_vm10 = vmor %vm614_vm9, %vm615_vm8  ;;  %v635_v31 = vand.u32 2147483648, %v502_v47 }
 0x26b   :  { %v611_v55 = vsub.f32 1.0, %v610_v44  ;;  %v608_v58 = vmul.f32 %v1654_v39, %v607_v26  ;;  %v633_v7 = vand.u32 2147483647, %v502_v47  ;;  %vm629_vm13 = vweird.f32 %v502_v47 }
 0x26c   :  { %v1704_v56 = vpop.eup %1334  ;;  %v485_v48 = vmul.f32 1.442695, %v454_v32  ;;  %v636_v11 = vor.u32 1.1754944e-38, %v635_v31 }
 0x26d   :  { %v612_v59 = vmul.f32 %v1333_v46, %v611_v55  ;;  %515 = vadd.xlane.f32.xlu0 %v1704_v56  ;;  %v761_v60 = vpack.c.bf16 %v608_v58, %v593_v37  ;;  %1022 = vst [vmem:[#allocation12 + $0x28] sm:$0xff] %v608_v58  ;;  %vm634_vm15 = vcmp.eq.f32.partialorder %v633_v7, 8.507059e+37 }
 0x26e   :  { %1338 = vpow2.f32 %v485_v48 }
 0x26f   :  { %v613_v61 = vadd.f32 %v1333_v46, %v612_v59  ;;  %849 = vmatmul.bf16.gmra.mxu2 %v761_v60 }
 0x270   :  { %v1337_v51 = vpop.eup %1336 }
 0x271   :  { %v625_v0 = vmul.f32 %v1337_v51, %v502_v47  ;;  %v504_v1 = vpop.xlane.xlu0 %503  ;;  %v617_v2 = vsel %vm616_vm10, %v1333_v46, %v613_v61  ;;  %vm630_vm12 = vweird.f32 %v1337_v51 }
 0x272   :  { %1340 = vrcp.f32 %v504_v1  ;;  %v622_v39 = vsel %vm619_vm11, %v621_v63, %v617_v2  ;;  %vm631_vm14 = vmor %vm629_vm13, %vm630_vm12  ;;  %v650_v18 = vand.u32 2147483648, %v504_v1  ;;  %v648_v23 = vand.u32 2147483647, %v504_v1 }
 0x273   :  { %v626_v3 = vsub.f32 1.0, %v625_v0  ;;  %v623_v4 = vmul.f32 %v1662_v45, %v622_v39  ;;  %vm644_vm1 = vweird.f32 %v504_v1 }
 0x274   :  { %v1709_v5 = vpop.eup %1338  ;;  %v651_v24 = vor.u32 1.1754944e-38, %v650_v18  ;;  %vm649_vm3 = vcmp.eq.f32.partialorder %v648_v23, 8.507059e+37 }
 0x275   :  { %v627_v6 = vmul.f32 %v1337_v51, %v626_v3  ;;  %517 = vadd.xlane.f32.xlu1 %v1709_v5  ;;  %1023 = vst [vmem:[#allocation12 + $0x30] sm:$0xff] %v623_v4 }
 0x277   :  { %v628_v8 = vadd.f32 %v1337_v51, %v627_v6 }
 0x278   :  { %v1341_v10 = vpop.eup %1340 }
 0x279   :  { %v640_v21 = vmul.f32 %v1341_v10, %v504_v1  ;;  %v632_v12 = vsel %vm631_vm14, %v1337_v51, %v628_v8  ;;  %vm645_vm0 = vweird.f32 %v1341_v10 }
 0x27a   :  { %v637_v16 = vsel %vm634_vm15, %v636_v11, %v632_v12  ;;  %vm646_vm2 = vmor %vm644_vm1, %vm645_vm0 }
 0x27b   :  { %v641_v17 = vsub.f32 1.0, %v640_v21  ;;  %v638_v45 = vmul.f32 %v1670_v52, %v637_v16  ;;  %v1270_v52 = vld [vmem:[#allocation10 + $0x30] sm:$0xff] }
 0x27c   :  { %953 = vmatpush.bf16.msra.mxu3 %v1270_v52 }
 0x27d   :  { %v642_v14 = vmul.f32 %v1341_v10, %v641_v17  ;;  %v762_v19 = vpack.c.bf16 %v638_v45, %v623_v4  ;;  %1024 = vst [vmem:[#allocation12 + $0x38] sm:$0xff] %v638_v45 }
 0x27f   :  { %v643_v38 = vadd.f32 %v1341_v10, %v642_v14  ;;  %854 = vmatmul.bf16.gmra.mxu2 %v762_v19 }
 0x280   :  { %954 = vmatpush.bf16.msra.mxu3 %v1269_v20 }
 0x281   :  { %v647_v25 = vsel %vm646_vm2, %v1341_v10, %v643_v38 }
 0x282   :  { %v652_v28 = vsel %vm649_vm3, %v651_v24, %v647_v25 }
 0x283   :  { %v653_v29 = vmul.f32 %v1674_v54, %v652_v28 }
 0x284   :  { %955 = vmatpush.bf16.msra.mxu3 %v1268_v27 }
 0x285   :  { %1025 = vst [vmem:[#allocation12 + $0x40] sm:$0xff] %v653_v29 }
 0x288   :  { %956 = vmatpush.bf16.msra.mxu3 %v1267_v33 }
 0x28c   :  { %957 = vmatpush.bf16.msra.mxu3 %v1266_v34 }
 0x290   :  { %958 = vmatpush.bf16.msra.mxu3 %v1265_v36 }
 0x294   :  { %959 = vmatpush.bf16.msra.mxu3 %v1264_v9 }
 0x2b8   :  { %v506_v37 = vpop.xlane.xlu1 %505 }
 0x2b9   :  { %1342 = vrcp.f32 %v506_v37  ;;  %v665_v46 = vand.u32 2147483648, %v506_v37  ;;  %v663_v47 = vand.u32 2147483647, %v506_v37  ;;  %vm659_vm5 = vweird.f32 %v506_v37 }
 0x2bb   :  { %v666_v53 = vor.u32 1.1754944e-38, %v665_v46  ;;  %vm664_vm7 = vcmp.eq.f32.partialorder %v663_v47, 8.507059e+37 }
 0x2bf   :  { %v1343_v54 = vpop.eup %1342 }
 0x2c0   :  { %v655_v40 = vmul.f32 %v1343_v54, %v506_v37  ;;  %v508_v41 = vpop.xlane.xlu2 %507  ;;  %vm660_vm4 = vweird.f32 %v1343_v54 }
 0x2c1   :  { %1344 = vrcp.f32 %v508_v41  ;;  %vm661_vm6 = vmor %vm659_vm5, %vm660_vm4  ;;  %v680_v59 = vand.u32 2147483648, %v508_v41  ;;  %v678_v61 = vand.u32 2147483647, %v508_v41  ;;  %vm674_vm9 = vweird.f32 %v508_v41 }
 0x2c2   :  { %v656_v43 = vsub.f32 1.0, %v655_v40 }
 0x2c3   :  { %v681_v0 = vor.u32 1.1754944e-38, %v680_v59  ;;  %vm679_vm11 = vcmp.eq.f32.partialorder %v678_v61, 8.507059e+37 }
 0x2c4   :  { %v657_v44 = vmul.f32 %v1343_v54, %v656_v43 }
 0x2c6   :  { %v658_v49 = vadd.f32 %v1343_v54, %v657_v44 }
 0x2c7   :  { %v1345_v50 = vpop.eup %1344 }
 0x2c8   :  { %v670_v32 = vmul.f32 %v1345_v50, %v508_v41  ;;  %v510_v55 = vpop.xlane.xlu0 %509  ;;  %v662_v26 = vsel %vm661_vm6, %v1343_v54, %v658_v49  ;;  %vm675_vm8 = vweird.f32 %v1345_v50 }
 0x2c9   :  { %1346 = vrcp.f32 %v510_v55  ;;  %v667_v57 = vsel %vm664_vm7, %v666_v53, %v662_v26  ;;  %vm676_vm10 = vmor %vm674_vm9, %vm675_vm8  ;;  %v695_v7 = vand.u32 2147483648, %v510_v55  ;;  %v693_v8 = vand.u32 2147483647, %v510_v55 }
 0x2ca   :  { %v671_v48 = vsub.f32 1.0, %v670_v32  ;;  %v668_v58 = vmul.f32 %v1679_v22, %v667_v57  ;;  %vm689_vm13 = vweird.f32 %v510_v55 }
 0x2cb   :  { %v696_v17 = vor.u32 1.1754944e-38, %v695_v7  ;;  %vm694_vm15 = vcmp.eq.f32.partialorder %v693_v8, 8.507059e+37 }
 0x2cc   :  { %v672_v15 = vmul.f32 %v1345_v50, %v671_v48  ;;  %v763_v60 = vpack.c.bf16 %v668_v58, %v653_v29  ;;  %1026 = vst [vmem:[#allocation12 + $0x48] sm:$0xff] %v668_v58 }
 0x2ce   :  { %859 = vmatmul.bf16.gmra.mxu2 %v763_v60  ;;  %v673_v51 = vadd.f32 %v1345_v50, %v672_v15 }
 0x2cf   :  { %v1347_v63 = vpop.eup %1346 }
 0x2d0   :  { %v685_v1 = vmul.f32 %v1347_v63, %v510_v55  ;;  %v512_v2 = vpop.xlane.xlu1 %511  ;;  %v677_v39 = vsel %vm676_vm10, %v1345_v50, %v673_v51  ;;  %vm690_vm12 = vweird.f32 %v1347_v63 }
 0x2d1   :  { %1348 = vrcp.f32 %v512_v2  ;;  %v682_v3 = vsel %vm679_vm11, %v681_v0, %v677_v39  ;;  %vm691_vm14 = vmor %vm689_vm13, %vm690_vm12  ;;  %v710_v23 = vand.u32 2147483648, %v512_v2  ;;  %v708_v25 = vand.u32 2147483647, %v512_v2 }
 0x2d2   :  { %v686_v4 = vsub.f32 1.0, %v685_v1  ;;  %v683_v22 = vmul.f32 %v1684_v42, %v682_v3  ;;  %v840_v31 = vpop.f32.mrf.mxu2  ;;  %vm704_vm1 = vweird.f32 %v512_v2 }
 0x2d3   :  { %v711_v27 = vor.u32 1.1754944e-38, %v710_v23  ;;  %vm709_vm3 = vcmp.eq.f32.partialorder %v708_v25, 8.507059e+37 }
 0x2d4   :  { %v687_v6 = vmul.f32 %v1347_v63, %v686_v4  ;;  %1027 = vst [vmem:[#allocation12 + $0x50] sm:$0xff] %v683_v22 }
 0x2d6   :  { %v688_v10 = vadd.f32 %v1347_v63, %v687_v6 }
 0x2d7   :  { %v1349_v11 = vpop.eup %1348 }
 0x2d8   :  { %v700_v21 = vmul.f32 %v1349_v11, %v512_v2  ;;  %v514_v12 = vpop.xlane.xlu2 %513  ;;  %v692_v16 = vsel %vm691_vm14, %v1347_v63, %v688_v10  ;;  %vm705_vm0 = vweird.f32 %v1349_v11 }
 0x2d9   :  { %1350 = vrcp.f32 %v514_v12  ;;  %v697_v18 = vsel %vm694_vm15, %v696_v17, %v692_v16  ;;  %vm706_vm2 = vmor %vm704_vm1, %vm705_vm0  ;;  %v725_v9 = vand.u32 2147483648, %v514_v12  ;;  %v723_v54 = vand.u32 2147483647, %v514_v12 }
 0x2da   :  { %v701_v45 = vsub.f32 1.0, %v700_v21  ;;  %v842_v14 = vpop.f32.mrf.mxu2  ;;  %v698_v42 = vmul.f32 %v1689_v62, %v697_v18  ;;  %vm719_vm5 = vweird.f32 %v514_v12 }
 0x2db   :  { %v880_v38 = vpack.c.bf16 %v842_v14, %v840_v31  ;;  %v726_v43 = vor.u32 1.1754944e-38, %v725_v9  ;;  %vm724_vm7 = vcmp.eq.f32.partialorder %v723_v54, 8.507059e+37 }
 0x2dc   :  { %v702_v19 = vmul.f32 %v1349_v11, %v701_v45  ;;  %v764_v24 = vpack.c.bf16 %v698_v42, %v683_v22  ;;  %1028 = vst [vmem:[#allocation12 + $0x58] sm:$0xff] %v698_v42 }
 0x2dd   :  { %960 = vmatmul.bf16.vlgmr.msra.gmra.mxu3 %v880_v38 }
 0x2de   :  { %v703_v28 = vadd.f32 %v1349_v11, %v702_v19  ;;  %864 = vmatmul.bf16.gmra.mxu2 %v764_v24 }
 0x2df   :  { %v1351_v29 = vpop.eup %1350 }
 0x2e0   :  { %v715_v30 = vmul.f32 %v1351_v29, %v514_v12  ;;  %v516_v52 = vpop.xlane.xlu0 %515  ;;  %v707_v20 = vsel %vm706_vm2, %v1349_v11, %v703_v28  ;;  %vm720_vm4 = vweird.f32 %v1351_v29 }
 0x2e1   :  { %1352 = vrcp.f32 %v516_v52  ;;  %v712_v33 = vsel %vm709_vm3, %v711_v27, %v707_v20  ;;  %vm721_vm6 = vmor %vm719_vm5, %vm720_vm4  ;;  %v740_v53 = vand.u32 2147483648, %v516_v52  ;;  %v738_v26 = vand.u32 2147483647, %v516_v52 }
 0x2e2   :  { %v716_v62 = vsub.f32 1.0, %v715_v30  ;;  %v845_v34 = vpop.f32.mrf.mxu2  ;;  %v713_v36 = vmul.f32 %v1694_v13, %v712_v33  ;;  %vm734_vm9 = vweird.f32 %v516_v52 }
 0x2e3   :  { %v741_v15 = vor.u32 1.1754944e-38, %v740_v53  ;;  %vm739_vm11 = vcmp.eq.f32.partialorder %v738_v26, 8.507059e+37 }
 0x2e4   :  { %v717_v37 = vmul.f32 %v1351_v29, %v716_v62  ;;  %1029 = vst [vmem:[#allocation12 + $0x60] sm:$0xff] %v713_v36 }
 0x2e6   :  { %v718_v40 = vadd.f32 %v1351_v29, %v717_v37 }
 0x2e7   :  { %v1353_v41 = vpop.eup %1352 }
 0x2e8   :  { %v730_v46 = vmul.f32 %v1353_v41, %v516_v52  ;;  %v518_v44 = vpop.xlane.xlu1 %517  ;;  %v722_v47 = vsel %vm721_vm6, %v1351_v29, %v718_v40  ;;  %vm735_vm8 = vweird.f32 %v1353_v41 }
 0x2e9   :  { %1354 = vrcp.f32 %v518_v44  ;;  %v727_v50 = vsel %vm724_vm7, %v726_v43, %v722_v47  ;;  %vm736_vm10 = vmor %vm734_vm9, %vm735_vm8  ;;  %v755_v0 = vand.u32 2147483648, %v518_v44  ;;  %v753_v39 = vand.u32 2147483647, %v518_v44 }
 0x2ea   :  { %v731_v49 = vsub.f32 1.0, %v730_v46  ;;  %v847_v32 = vpop.f32.mrf.mxu2  ;;  %v728_v13 = vmul.f32 %v1699_v35, %v727_v50  ;;  %vm749_vm13 = vweird.f32 %v518_v44 }
 0x2eb   :  { %v881_v57 = vpack.c.bf16 %v847_v32, %v845_v34  ;;  %v756_v4 = vor.u32 1.1754944e-38, %v755_v0  ;;  %vm754_vm15 = vcmp.eq.f32.partialorder %v753_v39, 8.507059e+37 }
 0x2ec   :  { %v732_v55 = vmul.f32 %v1353_v41, %v731_v49  ;;  %v765_v48 = vpack.c.bf16 %v728_v13, %v713_v36  ;;  %1030 = vst [vmem:[#allocation12 + $0x68] sm:$0xff] %v728_v13 }
 0x2ed   :  { %965 = vmatmul.bf16.gmra.mxu3 %v881_v57 }
 0x2ee   :  { %v733_v58 = vadd.f32 %v1353_v41, %v732_v55  ;;  %869 = vmatmul.bf16.gmra.mxu2 %v765_v48 }
 0x2ef   :  { %v1355_v59 = vpop.eup %1354 }
 0x2f0   :  { %v745_v60 = vmul.f32 %v1355_v59, %v518_v44  ;;  %v737_v61 = vsel %vm736_vm10, %v1353_v41, %v733_v58  ;;  %vm750_vm12 = vweird.f32 %v1355_v59 }
 0x2f1   :  { %v742_v51 = vsel %vm739_vm11, %v741_v15, %v737_v61  ;;  %vm751_vm14 = vmor %vm749_vm13, %vm750_vm12 }
 0x2f2   :  { %v746_v63 = vsub.f32 1.0, %v745_v60  ;;  %v743_v35 = vmul.f32 %v1704_v56, %v742_v51  ;;  %v850_v1 = vpop.f32.mrf.mxu2 }
 0x2f4   :  { %v747_v2 = vmul.f32 %v1355_v59, %v746_v63  ;;  %1031 = vst [vmem:[#allocation12 + $0x70] sm:$0xff] %v743_v35 }
 0x2f6   :  { %v748_v3 = vadd.f32 %v1355_v59, %v747_v2 }
 0x2f8   :  { %v752_v22 = vsel %vm751_vm14, %v1355_v59, %v748_v3 }
 0x2f9   :  { %v757_v31 = vsel %vm754_vm15, %v756_v4, %v752_v22 }
 0x2fa   :  { %v758_v6 = vmul.f32 %v1709_v5, %v757_v31  ;;  %v852_v7 = vpop.f32.mrf.mxu2 }
 0x2fb   :  { %v882_v8 = vpack.c.bf16 %v852_v7, %v850_v1 }
 0x2fc   :  { %v766_v10 = vpack.c.bf16 %v758_v6, %v743_v35  ;;  %1032 = vst [vmem:[#allocation12 + $0x78] sm:$0xff] %v758_v6 }
 0x2fd   :  { %970 = vmatmul.bf16.gmra.mxu3 %v882_v8  ;;  %1058 = dma.vmem_to_hbm [thread:$0]  %s1051_s25, 2048, %s1053_s28, [#allocation13], %s1542_s29, %s1542_s29, %s1543_s30  }
 0x2fe   :  { %874 = vmatmul.bf16.gmra.mxu2 %v766_v10 }
 0x302   :  { %v855_v56 = vpop.f32.mrf.mxu2 }
 0x30a   :  { %v857_v11 = vpop.f32.mrf.mxu2 }
 0x30b   :  { %v883_v21 = vpack.c.bf16 %v857_v11, %v855_v56 }
 0x30d   :  { %975 = vmatmul.bf16.gmra.mxu3 %v883_v21 }
 0x351   :  { %v860_v12 = vpop.f32.mrf.mxu2 }
 0x359   :  { %v862_v16 = vpop.f32.mrf.mxu2 }
 0x35a   :  { %v884_v17 = vpack.c.bf16 %v862_v16, %v860_v12 }
 0x35c   :  { %980 = vmatmul.bf16.gmra.mxu3 %v884_v17 }
 0x360   :  { %v961_v45 = vpop.f32.mrf.mxu3 }
 0x361   :  { %1001 = vst [vmem:[#allocation11] sm:$0xff] %v961_v45  ;;  %v865_v18 = vpop.f32.mrf.mxu2 }
 0x368   :  { %v963_v14 = vpop.f32.mrf.mxu3 }
 0x369   :  { %1002 = vst [vmem:[#allocation11 + $0x8] sm:$0xff] %v963_v14  ;;  %v867_v5 = vpop.f32.mrf.mxu2 }
 0x36a   :  { %v885_v42 = vpack.c.bf16 %v867_v5, %v865_v18 }
 0x36c   :  { %985 = vmatmul.bf16.gmra.mxu3 %v885_v42 }
 0x370   :  { %v966_v19 = vpop.f32.mrf.mxu3 }
 0x371   :  { %1003 = vst [vmem:[#allocation11 + $0x10] sm:$0xff] %v966_v19  ;;  %v870_v23 = vpop.f32.mrf.mxu2 }
 0x378   :  { %v968_v38 = vpop.f32.mrf.mxu3 }
 0x379   :  { %1004 = vst [vmem:[#allocation11 + $0x18] sm:$0xff] %v968_v38  ;;  %v872_v24 = vpop.f32.mrf.mxu2 }
 0x37a   :  { %v886_v25 = vpack.c.bf16 %v872_v24, %v870_v23 }
 0x37c   :  { %990 = vmatmul.bf16.gmra.mxu3 %v886_v25 }
 0x380   :  { %v971_v28 = vpop.f32.mrf.mxu3 }
 0x381   :  { %1005 = vst [vmem:[#allocation11 + $0x20] sm:$0xff] %v971_v28  ;;  %v875_v29 = vpop.f32.mrf.mxu2 }
 0x388   :  { %v973_v30 = vpop.f32.mrf.mxu3 }
 0x389   :  { %1006 = vst [vmem:[#allocation11 + $0x28] sm:$0xff] %v973_v30  ;;  %v877_v52 = vpop.f32.mrf.mxu2 }
 0x38a   :  { %v887_v20 = vpack.c.bf16 %v877_v52, %v875_v29 }
 0x38c   :  { %995 = vmatmul.bf16.gmra.mxu3 %v887_v20 }
 0x390   :  { %v976_v27 = vpop.f32.mrf.mxu3 }
 0x391   :  { %1007 = vst [vmem:[#allocation11 + $0x30] sm:$0xff] %v976_v27 }
 0x398   :  { %v978_v62 = vpop.f32.mrf.mxu3 }
 0x399   :  { %1008 = vst [vmem:[#allocation11 + $0x38] sm:$0xff] %v978_v62 }
 0x3df   :  { %v981_v33 = vpop.f32.mrf.mxu3 }
 0x3e0   :  { %1009 = vst [vmem:[#allocation11 + $0x40] sm:$0xff] %v981_v33 }
 0x3e7   :  { %v983_v34 = vpop.f32.mrf.mxu3 }
 0x3e8   :  { %1010 = vst [vmem:[#allocation11 + $0x48] sm:$0xff] %v983_v34 }
 0x3ef   :  { %v986_v36 = vpop.f32.mrf.mxu3 }
 0x3f0   :  { %1011 = vst [vmem:[#allocation11 + $0x50] sm:$0xff] %v986_v36 }
 0x3f7   :  { %v988_v37 = vpop.f32.mrf.mxu3 }
 0x3f8   :  { %1012 = vst [vmem:[#allocation11 + $0x58] sm:$0xff] %v988_v37 }
 0x3ff   :  { %v991_v9 = vpop.f32.mrf.mxu3 }
 0x400   :  { %1013 = vst [vmem:[#allocation11 + $0x60] sm:$0xff] %v991_v9 }
 0x407   :  { %v993_v54 = vpop.f32.mrf.mxu3 }
 0x408   :  { %1014 = vst [vmem:[#allocation11 + $0x68] sm:$0xff] %v993_v54 }
 0x40f   :  { %v996_v40 = vpop.f32.mrf.mxu3 }
 0x410   :  { %1015 = vst [vmem:[#allocation11 + $0x70] sm:$0xff] %v996_v40 }
 0x417   :  { %v998_v41 = vpop.f32.mrf.mxu3 }
 0x418   :  { %1016 = vst [vmem:[#allocation11 + $0x78] sm:$0xff] %v998_v41 }
 0x419   :  { %1045 = dma.vmem_to_hbm [thread:$0]  %s1038_s8, 2048, %s1040_s11, [#allocation4], %s1542_s29, %s1542_s29, %s1543_s30  }
 0x41a   :  { %1530 = dma.done.wait [#allocation4], 2048  }
 0x41b   :  { %1531 = vsyncadd [#allocation4], 4294965248 }
 0x41c   :  { %1532 = dma.done.wait [#allocation13], 2048  }
 0x41d   :  { %1533 = vsyncadd [#allocation13], 4294965248 }
 0x41e   :  { %1067 = vsyncpa [#allocation3], 1 }
 0x41f   :  { %1068 = vsyncpa [#allocation6], 1 }
 0x420   :  { %1069 = vsyncpa [#allocation9], 1 }
 0x421   :  { %1070 = vsyncpa [#allocation4], 1 }
 0x422   :  { %1071 = vsyncpa [#allocation13], 1 }

// kernel: tpu_custom_call.1
= control target key start
LH: loop header
LB: loop body
LE: loop exit
PB: predicated region body
PF: predicated region fallthrough
CT: control target
= control target key end

     0   :  { %13 = vsyncpa [#allocation3], 0  ;;  %s1727_s0 = inlined_call_operand.hbm [shape: bf16[128,128], index: 0, kind: input, shape index: {}]   ;;  %s1728_s1 = inlined_call_operand.hbm [shape: bf16[128,128], index: 1, kind: input, shape index: {}]   ;;  %s1729_s2 = inlined_call_operand.hbm [shape: bf16[128,128], index: 2, kind: input, shape index: {}]   ;;  %s1730_s3 = inlined_call_operand.hbm [shape: bf16[128,128], index: 3, kind: input, shape index: {}]   ;;  %s1731_s4 = inlined_call_operand.hbm [shape: bf16[128,128], index: 4, kind: input, shape index: {}]   ;;  %s1732_s5 = inlined_call_operand.vmem [shape: f32[1,128], index: 5, kind: input, shape index: {}]   ;;  %s1733_s6 = inlined_call_operand.hbm [shape: f32[128,128], index: 6, kind: output, shape index: {0}]   ;;  %s1734_s7 = inlined_call_operand.hbm [shape: f32[128,128], index: 7, kind: output, shape index: {1}]  }
   0x1   :  { %14 = vsyncpa [#allocation6], 0 }
   0x2   :  { %15 = vsyncpa [#allocation9], 0 }
   0x3   :  { %16 = vsyncpa [#allocation4], 0 }
   0x4   :  { %17 = vsyncpa [#allocation13], 0  ;;  %s35_s26 = sshll.u32 %s1728_s1, 4  ;;  %s1534_s27 = smov [#allocation5]   ;;  %s36_s26 = int_to_ptr.hbm [resolvable:$true] %s35_s26 }
   0x5   :  { %s37_s28 = sshll.u32 %s1534_s27, 4  ;;  %s61_s8 = sshll.u32 %s1730_s3, 4  ;;  %s38_s28 = int_to_ptr.vmem [resolvable:$true] %s37_s28  ;;  %s62_s8 = int_to_ptr.hbm [resolvable:$true] %s61_s8 }
   0x6   :  { %s1535_s9 = smov 64   ;;  %s1536_s10 = smov 4  }
   0x7   :  { %43 = dma.hbm_to_vmem [thread:$0]  %s36_s26, 1024, %s38_s28, [#allocation6], %s1535_s9, %s1535_s9, %s1536_s10  }
   0x8   :  { %s1537_s11 = smov [#allocation8]   ;;  %s22_s15 = sshll.u32 %s1727_s0, 4  ;;  %s23_s15 = int_to_ptr.hbm [resolvable:$true] %s22_s15 }
   0x9   :  { %s63_s12 = sshll.u32 %s1537_s11, 4  ;;  %s48_s17 = sshll.u32 %s1729_s2, 4  ;;  %s64_s12 = int_to_ptr.vmem [resolvable:$true] %s63_s12  ;;  %s49_s17 = int_to_ptr.hbm [resolvable:$true] %s48_s17 }
   0xa   :  { %69 = dma.hbm_to_vmem [thread:$0]  %s62_s8, 1024, %s64_s12, [#allocation9], %s1535_s9, %s1535_s9, %s1536_s10  }
   0xb   :  { %s1538_s18 = smov [#allocation2]   ;;  %s1539_s3 = smov [#allocation7]  }
   0xc   :  { %s24_s19 = sshll.u32 %s1538_s18, 4  ;;  %s50_s20 = sshll.u32 %s1539_s3, 4  ;;  %s25_s19 = int_to_ptr.vmem [resolvable:$true] %s24_s19  ;;  %s51_s20 = int_to_ptr.vmem [resolvable:$true] %s50_s20 }
   0xd   :  { %30 = dma.hbm_to_vmem [thread:$0]  %s23_s15, 1024, %s25_s19, [#allocation3], %s1535_s9, %s1535_s9, %s1536_s10  }
   0xe   :  { %s74_s23 = sshll.u32 %s1731_s4, 4  ;;  %s1540_s0 = smov [#allocation10]   ;;  %s75_s23 = int_to_ptr.hbm [resolvable:$true] %s74_s23 }
   0xf   :  { %56 = dma.hbm_to_vmem [thread:$0]  %s49_s17, 1024, %s51_s20, [#allocation6], %s1535_s9, %s1535_s9, %s1536_s10  }
  0x10   :  { %s76_s24 = sshll.u32 %s1540_s0, 4  ;;  %s77_s24 = int_to_ptr.vmem [resolvable:$true] %s76_s24 }
  0x11   :  { %82 = dma.hbm_to_vmem [thread:$0]  %s75_s23, 1024, %s77_s24, [#allocation9], %s1535_s9, %s1535_s9, %s1536_s10  }
  0x12   :  { %1524 = dma.done.wait [#allocation3], 1024  }
  0x13   :  { %1525 = vsyncadd [#allocation3], 4294966272 }
  0x14   :  { %1526 = dma.done.wait [#allocation6], 2048  }
  0x15   :  { %1527 = vsyncadd [#allocation6], 4294965248 }
  0x16   :  { %1528 = dma.done.wait [#allocation9], 2048  }
  0x17   :  { %1529 = vsyncadd [#allocation9], 4294965248  ;;  %v1247_v0 = vld [vmem:[#allocation5 + $0x38] sm:$0xff]  ;;  %v1246_v1 = vld [vmem:[#allocation5 + $0x30] sm:$0xff]  ;;  %s1052_s28 = sshll.u32 %s1734_s7, 4  ;;  %s1542_s29 = smov 128   ;;  %s1053_s28 = int_to_ptr.hbm [resolvable:$true] %s1052_s28 }
  0x18   :  { %233 = vmatpush.bf16.msra.mxu0 %v1247_v0  ;;  %v1255_v2 = vld [vmem:[#allocation7 + $0x38] sm:$0xff]  ;;  %v1245_v3 = vld [vmem:[#allocation5 + $0x28] sm:$0xff]  ;;  %v1244_v4 = vld [vmem:[#allocation5 + $0x20] sm:$0xff]  ;;  %s1543_s30 = smov 8   ;;  %s1544_s7 = smov [#allocation11]  }
  0x19   :  { %1272 = vmatpush.bf16.xpose.msra.mxu1 %v1255_v2  ;;  %v1243_v5 = vld [vmem:[#allocation5 + $0x18] sm:$0xff]  ;;  %v1254_v6 = vld [vmem:[#allocation7 + $0x30] sm:$0xff]  ;;  %v1241_v8 = vld [vmem:[#allocation5 + $0x8] sm:$0xff]  ;;  %s1037_s8 = sshll.u32 %s1544_s7, 4  ;;  %s1039_s11 = sshll.u32 %s1733_s6, 4  ;;  %s1038_s8 = int_to_ptr.vmem [resolvable:$true] %s1037_s8  ;;  %s1040_s11 = int_to_ptr.hbm [resolvable:$true] %s1039_s11 }
  0x1a   :  { %v1242_v7 = vld [vmem:[#allocation5 + $0x10] sm:$0xff]  ;;  %v1240_v9 = vld [vmem:[#allocation5] sm:$0xff]  ;;  %v1253_v11 = vld [vmem:[#allocation7 + $0x28] sm:$0xff] }
  0x1b   :  { %v1232_v10 = vld [vmem:[#allocation2] sm:$0xff]  ;;  %v1233_v12 = vld [vmem:[#allocation2 + $0x8] sm:$0xff]  ;;  %v1234_v14 = vld [vmem:[#allocation2 + $0x10] sm:$0xff] }
  0x1c   :  { %234 = vmatpush.bf16.msra.mxu0 %v1246_v1  ;;  %v1252_v13 = vld [vmem:[#allocation7 + $0x20] sm:$0xff]  ;;  %v1251_v15 = vld [vmem:[#allocation7 + $0x18] sm:$0xff]  ;;  %v1250_v17 = vld [vmem:[#allocation7 + $0x10] sm:$0xff] }
  0x1d   :  { %v1235_v16 = vld [vmem:[#allocation2 + $0x18] sm:$0xff]  ;;  %v1236_v18 = vld [vmem:[#allocation2 + $0x20] sm:$0xff]  ;;  %v1249_v19 = vld [vmem:[#allocation7 + $0x8] sm:$0xff] }
  0x1e   :  { %v1237_v20 = vld [vmem:[#allocation2 + $0x28] sm:$0xff]  ;;  %v1248_v21 = vld [vmem:[#allocation7] sm:$0xff]  ;;  %v1238_v22 = vld [vmem:[#allocation2 + $0x30] sm:$0xff] }
  0x1f   :  { %v1239_v23 = vld [vmem:[#allocation2 + $0x38] sm:$0xff]  ;;  %v1603_v48 = vld [vmem:[%s1732_s5] ss:$0 sm:$0xff]  ;;  %s1541_s5 = smov [#allocation12]  }
  0x20   :  { %235 = vmatpush.bf16.msra.mxu0 %v1245_v3  ;;  %s1050_s25 = sshll.u32 %s1541_s5, 4  ;;  %s1051_s25 = int_to_ptr.vmem [resolvable:$true] %s1050_s25 }
  0x21   :  { %1273 = vmatpush.bf16.xpose.msra.mxu1 %v1254_v6 }
  0x24   :  { %236 = vmatpush.bf16.msra.mxu0 %v1244_v4 }
  0x28   :  { %237 = vmatpush.bf16.msra.mxu0 %v1243_v5 }
  0x29   :  { %1274 = vmatpush.bf16.xpose.msra.mxu1 %v1253_v11 }
  0x2c   :  { %238 = vmatpush.bf16.msra.mxu0 %v1242_v7 }
  0x30   :  { %239 = vmatpush.bf16.msra.mxu0 %v1241_v8 }
  0x31   :  { %1275 = vmatpush.bf16.xpose.msra.mxu1 %v1252_v13 }
  0x34   :  { %240 = vmatpush.bf16.msra.mxu0 %v1240_v9 }
  0x37   :  { %241 = vmatmul.bf16.vlgmr.msra.gmra.mxu0 %v1232_v10 }
  0x38   :  { %358 = vmatpush.bf16.xpose.msrb.mxu0 %v1255_v2 }
  0x39   :  { %1276 = vmatpush.bf16.xpose.msra.mxu1 %v1251_v15 }
  0x40   :  { %359 = vmatpush.bf16.xpose.msrb.mxu0 %v1254_v6 }
  0x41   :  { %1277 = vmatpush.bf16.xpose.msra.mxu1 %v1250_v17 }
  0x47   :  { %246 = vmatmul.bf16.gmra.mxu0 %v1233_v12 }
  0x48   :  { %360 = vmatpush.bf16.xpose.msrb.mxu0 %v1253_v11 }
  0x49   :  { %1278 = vmatpush.bf16.xpose.msra.mxu1 %v1249_v19 }
  0x50   :  { %361 = vmatpush.bf16.xpose.msrb.mxu0 %v1252_v13 }
  0x51   :  { %1279 = vmatpush.bf16.xpose.msra.mxu1 %v1248_v21 }
  0x57   :  { %251 = vmatmul.bf16.gmra.mxu0 %v1234_v14 }
  0x58   :  { %362 = vmatpush.bf16.xpose.msrb.mxu0 %v1251_v15 }
  0x60   :  { %363 = vmatpush.bf16.xpose.msrb.mxu0 %v1250_v17 }
  0x67   :  { %256 = vmatmul.bf16.gmra.mxu0 %v1235_v16 }
  0x68   :  { %364 = vmatpush.bf16.xpose.msrb.mxu0 %v1249_v19 }
  0x70   :  { %365 = vmatpush.bf16.xpose.msrb.mxu0 %v1248_v21 }
  0x77   :  { %261 = vmatmul.bf16.gmra.mxu0 %v1236_v18 }
  0x87   :  { %266 = vmatmul.bf16.gmra.mxu0 %v1237_v20 }
  0x97   :  { %271 = vmatmul.bf16.gmra.mxu0 %v1238_v22 }
  0xa7   :  { %276 = vmatmul.bf16.gmra.mxu0 %v1239_v23 }
  0xb4   :  { %v242_v24 = vpop.f32.mrf.mxu0 }
  0xbc   :  { %v244_v25 = vpop.f32.mrf.mxu0 }
  0xbd   :  { %v282_v26 = vpack.c.bf16 %v244_v25, %v242_v24 }
  0xbf   :  { %366 = vmatmul.bf16.vlgmr.msrb.gmra.mxu0 %v282_v26 }
  0xc4   :  { %v247_v27 = vpop.f32.mrf.mxu0 }
  0xcc   :  { %v249_v28 = vpop.f32.mrf.mxu0 }
  0xcd   :  { %v283_v29 = vpack.c.bf16 %v249_v28, %v247_v27 }
  0xcf   :  { %371 = vmatmul.bf16.vlgmr.msra.gmra.mxu1 %v283_v29 }
  0xd4   :  { %v252_v30 = vpop.f32.mrf.mxu0 }
  0xdc   :  { %v254_v31 = vpop.f32.mrf.mxu0 }
  0xdd   :  { %v284_v32 = vpack.c.bf16 %v254_v31, %v252_v30 }
  0xdf   :  { %376 = vmatmul.bf16.gmra.mxu1 %v284_v32 }
  0xe4   :  { %v257_v33 = vpop.f32.mrf.mxu0 }
  0xec   :  { %v259_v34 = vpop.f32.mrf.mxu0 }
  0xed   :  { %v285_v35 = vpack.c.bf16 %v259_v34, %v257_v33 }
  0xef   :  { %381 = vmatmul.bf16.gmra.mxu1 %v285_v35  ;;  %v1263_v35 = vld [vmem:[#allocation8 + $0x38] sm:$0xff] }
  0xf0   :  { %831 = vmatpush.bf16.msra.mxu2 %v1263_v35 }
  0xf4   :  { %v262_v36 = vpop.f32.mrf.mxu0 }
  0xfc   :  { %v264_v37 = vpop.f32.mrf.mxu0 }
  0xfd   :  { %v286_v38 = vpack.c.bf16 %v264_v37, %v262_v36 }
  0xff   :  { %386 = vmatmul.bf16.gmra.mxu1 %v286_v38 }
 0x104   :  { %v267_v39 = vpop.f32.mrf.mxu0 }
 0x10c   :  { %v269_v40 = vpop.f32.mrf.mxu0 }
 0x10d   :  { %v287_v41 = vpack.c.bf16 %v269_v40, %v267_v39 }
 0x10f   :  { %391 = vmatmul.bf16.gmra.mxu1 %v287_v41 }
 0x114   :  { %v272_v42 = vpop.f32.mrf.mxu0 }
 0x11c   :  { %v274_v43 = vpop.f32.mrf.mxu0 }
 0x11d   :  { %v288_v44 = vpack.c.bf16 %v274_v43, %v272_v42 }
 0x11f   :  { %396 = vmatmul.bf16.gmra.mxu1 %v288_v44 }
 0x124   :  { %v277_v45 = vpop.f32.mrf.mxu0 }
 0x12c   :  { %v279_v46 = vpop.f32.mrf.mxu0 }
 0x12d   :  { %v289_v47 = vpack.c.bf16 %v279_v46, %v277_v45 }
 0x12f   :  { %401 = vmatmul.bf16.gmra.mxu1 %v289_v47 }
 0x13c   :  { %v367_v49 = vpop.f32.mrf.mxu0 }
 0x13d   :  { %v368_v50 = vadd.f32 %v1603_v48, %v367_v49 }
 0x13f   :  { %407 = vmax.xlane.f32.xlu0 %v368_v50 }
 0x144   :  { %v369_v51 = vpop.f32.mrf.mxu0 }
 0x145   :  { %v370_v52 = vadd.f32 %v1603_v48, %v369_v51 }
 0x147   :  { %409 = vmax.xlane.f32.xlu0 %v370_v52 }
 0x14c   :  { %v372_v53 = vpop.f32.mrf.mxu1 }
 0x14d   :  { %v373_v54 = vadd.f32 %v1603_v48, %v372_v53 }
 0x14f   :  { %411 = vmax.xlane.f32.xlu1 %v373_v54 }
 0x154   :  { %v374_v55 = vpop.f32.mrf.mxu1 }
 0x155   :  { %v375_v56 = vadd.f32 %v1603_v48, %v374_v55  ;;  %v1262_v55 = vld [vmem:[#allocation8 + $0x30] sm:$0xff] }
 0x156   :  { %832 = vmatpush.bf16.msra.mxu2 %v1262_v55 }
 0x157   :  { %413 = vmax.xlane.f32.xlu1 %v375_v56 }
 0x15c   :  { %v377_v57 = vpop.f32.mrf.mxu1 }
 0x15d   :  { %v378_v58 = vadd.f32 %v1603_v48, %v377_v57  ;;  %v1260_v57 = vld [vmem:[#allocation8 + $0x20] sm:$0xff] }
 0x15f   :  { %415 = vmax.xlane.f32.xlu2 %v378_v58 }
 0x164   :  { %v379_v59 = vpop.f32.mrf.mxu1 }
 0x165   :  { %v380_v60 = vadd.f32 %v1603_v48, %v379_v59  ;;  %v1257_v59 = vld [vmem:[#allocation8 + $0x8] sm:$0xff] }
 0x167   :  { %417 = vmax.xlane.f32.xlu2 %v380_v60 }
 0x16c   :  { %v382_v61 = vpop.f32.mrf.mxu1 }
 0x16d   :  { %v383_v62 = vadd.f32 %v1603_v48, %v382_v61 }
 0x16f   :  { %419 = vmax.xlane.f32.xlu0 %v383_v62 }
 0x174   :  { %v384_v63 = vpop.f32.mrf.mxu1 }
 0x175   :  { %v1613_v0 = vadd.f32 %v1603_v48, %v384_v63 }
 0x177   :  { %421 = vmax.xlane.f32.xlu1 %v1613_v0 }
 0x17c   :  { %v387_v1 = vpop.f32.mrf.mxu1 }
 0x17d   :  { %v1617_v2 = vadd.f32 %v1603_v48, %v387_v1 }
 0x17f   :  { %423 = vmax.xlane.f32.xlu1 %v1617_v2 }
 0x184   :  { %v389_v5 = vpop.f32.mrf.mxu1 }
 0x185   :  { %v1624_v14 = vadd.f32 %v1603_v48, %v389_v5 }
 0x18c   :  { %v392_v11 = vpop.f32.mrf.mxu1 }
 0x18d   :  { %v1631_v20 = vadd.f32 %v1603_v48, %v392_v11 }
 0x194   :  { %v394_v17 = vpop.f32.mrf.mxu1 }
 0x195   :  { %v1638_v26 = vadd.f32 %v1603_v48, %v394_v17 }
 0x19c   :  { %v397_v24 = vpop.f32.mrf.mxu1 }
 0x19d   :  { %v1645_v31 = vadd.f32 %v1603_v48, %v397_v24 }
 0x1a4   :  { %v399_v33 = vpop.f32.mrf.mxu1 }
 0x1a5   :  { %v1652_v38 = vadd.f32 %v1603_v48, %v399_v33 }
 0x1ac   :  { %v402_v41 = vpop.f32.mrf.mxu1 }
 0x1ad   :  { %v1660_v44 = vadd.f32 %v1603_v48, %v402_v41 }
 0x1b2   :  { %v408_v3 = vpop.xlane.xlu0 %407 }
 0x1b3   :  { %v439_v4 = vsub.f32 %v368_v50, %v408_v3 }
 0x1b4   :  { %v404_v47 = vpop.f32.mrf.mxu1 }
 0x1b5   :  { %v455_v6 = vmul.f32 1.442695, %v439_v4  ;;  %v1668_v51 = vadd.f32 %v1603_v48, %v404_v47  ;;  %v1259_v48 = vld [vmem:[#allocation8 + $0x18] sm:$0xff] }
 0x1b7   :  { %1292 = vpow2.f32 %v455_v6 }
 0x1ba   :  { %v410_v7 = vpop.xlane.xlu0 %409 }
 0x1bb   :  { %v440_v8 = vsub.f32 %v370_v52, %v410_v7 }
 0x1bd   :  { %v1620_v9 = vpop.eup %1292  ;;  %v457_v10 = vmul.f32 1.442695, %v440_v8 }
 0x1be   :  { %487 = vadd.xlane.f32.xlu2 %v1620_v9 }
 0x1bf   :  { %1294 = vpow2.f32 %v457_v10 }
 0x1c2   :  { %v412_v12 = vpop.xlane.xlu1 %411 }
 0x1c3   :  { %v441_v13 = vsub.f32 %v373_v54, %v412_v12 }
 0x1c5   :  { %v1626_v15 = vpop.eup %1294  ;;  %v459_v16 = vmul.f32 1.442695, %v441_v13 }
 0x1c6   :  { %425 = vmax.xlane.f32.xlu2 %v1624_v14  ;;  %489 = vadd.xlane.f32.xlu0 %v1626_v15 }
 0x1c7   :  { %1296 = vpow2.f32 %v459_v16 }
 0x1ca   :  { %v414_v18 = vpop.xlane.xlu1 %413 }
 0x1cb   :  { %v442_v19 = vsub.f32 %v375_v56, %v414_v18  ;;  %v1261_v56 = vld [vmem:[#allocation8 + $0x28] sm:$0xff] }
 0x1cc   :  { %833 = vmatpush.bf16.msra.mxu2 %v1261_v56 }
 0x1cd   :  { %v1633_v21 = vpop.eup %1296  ;;  %v461_v22 = vmul.f32 1.442695, %v442_v19 }
 0x1ce   :  { %427 = vmax.xlane.f32.xlu2 %v1631_v20  ;;  %491 = vadd.xlane.f32.xlu0 %v1633_v21 }
 0x1cf   :  { %1298 = vpow2.f32 %v461_v22 }
 0x1d0   :  { %834 = vmatpush.bf16.msra.mxu2 %v1260_v57 }
 0x1d2   :  { %v416_v23 = vpop.xlane.xlu2 %415 }
 0x1d3   :  { %v443_v25 = vsub.f32 %v378_v58, %v416_v23  ;;  %v1258_v58 = vld [vmem:[#allocation8 + $0x10] sm:$0xff] }
 0x1d4   :  { %835 = vmatpush.bf16.msra.mxu2 %v1259_v48 }
 0x1d5   :  { %v1640_v27 = vpop.eup %1298  ;;  %v463_v28 = vmul.f32 1.442695, %v443_v25 }
 0x1d6   :  { %493 = vadd.xlane.f32.xlu1 %v1640_v27  ;;  %429 = vmax.xlane.f32.xlu0 %v1638_v26 }
 0x1d7   :  { %1300 = vpow2.f32 %v463_v28 }
 0x1d8   :  { %836 = vmatpush.bf16.msra.mxu2 %v1258_v58 }
 0x1da   :  { %v418_v29 = vpop.xlane.xlu2 %417 }
 0x1db   :  { %v444_v30 = vsub.f32 %v380_v60, %v418_v29  ;;  %v1256_v60 = vld [vmem:[#allocation8] sm:$0xff] }
 0x1dc   :  { %837 = vmatpush.bf16.msra.mxu2 %v1257_v59 }
 0x1dd   :  { %v1647_v32 = vpop.eup %1300  ;;  %v465_v34 = vmul.f32 1.442695, %v444_v30 }
 0x1de   :  { %495 = vadd.xlane.f32.xlu1 %v1647_v32  ;;  %431 = vmax.xlane.f32.xlu0 %v1645_v31 }
 0x1df   :  { %1302 = vpow2.f32 %v465_v34 }
 0x1e0   :  { %838 = vmatpush.bf16.msra.mxu2 %v1256_v60 }
 0x1e2   :  { %v420_v36 = vpop.xlane.xlu0 %419 }
 0x1e3   :  { %v445_v37 = vsub.f32 %v383_v62, %v420_v36 }
 0x1e5   :  { %v1654_v39 = vpop.eup %1302  ;;  %v467_v40 = vmul.f32 1.442695, %v445_v37 }
 0x1e6   :  { %433 = vmax.xlane.f32.xlu1 %v1652_v38  ;;  %497 = vadd.xlane.f32.xlu2 %v1654_v39 }
 0x1e7   :  { %1304 = vpow2.f32 %v467_v40 }
 0x1ea   :  { %v422_v42 = vpop.xlane.xlu1 %421 }
 0x1eb   :  { %v446_v43 = vsub.f32 %v1613_v0, %v422_v42 }
 0x1ed   :  { %v1662_v45 = vpop.eup %1304  ;;  %v469_v46 = vmul.f32 1.442695, %v446_v43 }
 0x1ee   :  { %499 = vadd.xlane.f32.xlu2 %v1662_v45  ;;  %435 = vmax.xlane.f32.xlu1 %v1660_v44 }
 0x1ef   :  { %1306 = vpow2.f32 %v469_v46 }
 0x1f2   :  { %v424_v49 = vpop.xlane.xlu1 %423 }
 0x1f3   :  { %v447_v50 = vsub.f32 %v1617_v2, %v424_v49 }
 0x1f5   :  { %v1670_v52 = vpop.eup %1306  ;;  %v471_v53 = vmul.f32 1.442695, %v447_v50 }
 0x1f6   :  { %501 = vadd.xlane.f32.xlu0 %v1670_v52  ;;  %437 = vmax.xlane.f32.xlu2 %v1668_v51 }
 0x1f7   :  { %1308 = vpow2.f32 %v471_v53 }
 0x1fd   :  { %v1674_v54 = vpop.eup %1308 }
 0x1fe   :  { %503 = vadd.xlane.f32.xlu0 %v1674_v54 }
 0x231   :  { %v488_v61 = vpop.xlane.xlu2 %487 }
 0x232   :  { %1310 = vrcp.f32 %v488_v61  ;;  %v530_v6 = vand.u32 2147483648, %v488_v61  ;;  %v528_v7 = vand.u32 2147483647, %v488_v61  ;;  %vm524_vm1 = vweird.f32 %v488_v61 }
 0x234   :  { %v531_v17 = vor.u32 1.1754944e-38, %v530_v6  ;;  %vm529_vm3 = vcmp.eq.f32.partialorder %v528_v7, 8.507059e+37 }
 0x238   :  { %v1311_v62 = vpop.eup %1310 }
 0x239   :  { %v520_v63 = vmul.f32 %v1311_v62, %v488_v61  ;;  %v426_v0 = vpop.xlane.xlu2 %425  ;;  %v490_v1 = vpop.xlane.xlu0 %489  ;;  %vm525_vm0 = vweird.f32 %v1311_v62 }
 0x23a   :  { %v448_v2 = vsub.f32 %v1624_v14, %v426_v0  ;;  %1312 = vrcp.f32 %v490_v1  ;;  %vm526_vm2 = vmor %vm524_vm1, %vm525_vm0  ;;  %v545_v28 = vand.u32 2147483648, %v490_v1  ;;  %v543_v29 = vand.u32 2147483647, %v490_v1 }
 0x23b   :  { %v521_v3 = vsub.f32 1.0, %v520_v63  ;;  %vm539_vm5 = vweird.f32 %v490_v1 }
 0x23c   :  { %v473_v4 = vmul.f32 1.442695, %v448_v2  ;;  %v546_v37 = vor.u32 1.1754944e-38, %v545_v28  ;;  %vm544_vm7 = vcmp.eq.f32.partialorder %v543_v29, 8.507059e+37 }
 0x23d   :  { %v522_v5 = vmul.f32 %v1311_v62, %v521_v3 }
 0x23e   :  { %1314 = vpow2.f32 %v473_v4 }
 0x23f   :  { %v523_v8 = vadd.f32 %v1311_v62, %v522_v5 }
 0x240   :  { %v1313_v10 = vpop.eup %1312 }
 0x241   :  { %v535_v11 = vmul.f32 %v1313_v10, %v490_v1  ;;  %v428_v12 = vpop.xlane.xlu2 %427  ;;  %v492_v13 = vpop.xlane.xlu0 %491  ;;  %v527_v16 = vsel %vm526_vm2, %v1311_v62, %v523_v8  ;;  %vm540_vm4 = vweird.f32 %v1313_v10 }
 0x242   :  { %v449_v18 = vsub.f32 %v1631_v20, %v428_v12  ;;  %1316 = vrcp.f32 %v492_v13  ;;  %v532_v19 = vsel %vm529_vm3, %v531_v17, %v527_v16  ;;  %vm541_vm6 = vmor %vm539_vm5, %vm540_vm4  ;;  %v560_v49 = vand.u32 2147483648, %v492_v13 }
 0x243   :  { %v536_v14 = vsub.f32 1.0, %v535_v11  ;;  %v533_v24 = vmul.f32 %v1620_v9, %v532_v19  ;;  %v558_v53 = vand.u32 2147483647, %v492_v13  ;;  %vm554_vm9 = vweird.f32 %v492_v13 }
 0x244   :  { %v1679_v22 = vpop.eup %1314  ;;  %v475_v23 = vmul.f32 1.442695, %v449_v18  ;;  %v561_v59 = vor.u32 1.1754944e-38, %v560_v49 }
 0x245   :  { %v537_v25 = vmul.f32 %v1313_v10, %v536_v14  ;;  %505 = vadd.xlane.f32.xlu1 %v1679_v22  ;;  %1017 = vst [vmem:[#allocation12] sm:$0xff] %v533_v24  ;;  %vm559_vm11 = vcmp.eq.f32.partialorder %v558_v53, 8.507059e+37 }
 0x246   :  { %1318 = vpow2.f32 %v475_v23 }
 0x247   :  { %v538_v30 = vadd.f32 %v1313_v10, %v537_v25 }
 0x248   :  { %v1317_v20 = vpop.eup %1316 }
 0x249   :  { %v550_v33 = vmul.f32 %v1317_v20, %v492_v13  ;;  %v494_v34 = vpop.xlane.xlu1 %493  ;;  %v430_v35 = vpop.xlane.xlu0 %429  ;;  %v542_v36 = vsel %vm541_vm6, %v1313_v10, %v538_v30  ;;  %vm555_vm8 = vweird.f32 %v1317_v20 }
 0x24a   :  { %1320 = vrcp.f32 %v494_v34  ;;  %v450_v9 = vsub.f32 %v1638_v26, %v430_v35  ;;  %v547_v41 = vsel %vm544_vm7, %v546_v37, %v542_v36  ;;  %vm556_vm10 = vmor %vm554_vm9, %vm555_vm8  ;;  %v575_v2 = vand.u32 2147483648, %v494_v34 }
 0x24b   :  { %v551_v40 = vsub.f32 1.0, %v550_v33  ;;  %v548_v46 = vmul.f32 %v1626_v15, %v547_v41  ;;  %v573_v3 = vand.u32 2147483647, %v494_v34  ;;  %vm569_vm13 = vweird.f32 %v494_v34 }
 0x24c   :  { %v1684_v42 = vpop.eup %1318  ;;  %v477_v43 = vmul.f32 1.442695, %v450_v9  ;;  %v576_v10 = vor.u32 1.1754944e-38, %v575_v2 }
 0x24d   :  { %v552_v47 = vmul.f32 %v1317_v20, %v551_v40  ;;  %507 = vadd.xlane.f32.xlu2 %v1684_v42  ;;  %v759_v50 = vpack.c.bf16 %v548_v46, %v533_v24  ;;  %1018 = vst [vmem:[#allocation12 + $0x8] sm:$0xff] %v548_v46  ;;  %vm574_vm15 = vcmp.eq.f32.partialorder %v573_v3, 8.507059e+37 }
 0x24e   :  { %1322 = vpow2.f32 %v477_v43 }
 0x24f   :  { %v553_v55 = vadd.f32 %v1317_v20, %v552_v47  ;;  %839 = vmatmul.bf16.vlgmr.msra.gmra.mxu2 %v759_v50 }
 0x250   :  { %v1321_v26 = vpop.eup %1320 }
 0x251   :  { %v565_v56 = vmul.f32 %v1321_v26, %v494_v34  ;;  %v496_v57 = vpop.xlane.xlu1 %495  ;;  %v432_v48 = vpop.xlane.xlu0 %431  ;;  %v557_v58 = vsel %vm556_vm10, %v1317_v20, %v553_v55  ;;  %vm570_vm12 = vweird.f32 %v1321_v26 }
 0x252   :  { %1324 = vrcp.f32 %v496_v57  ;;  %v451_v15 = vsub.f32 %v1645_v31, %v432_v48  ;;  %v562_v61 = vsel %vm559_vm11, %v561_v59, %v557_v58  ;;  %vm571_vm14 = vmor %vm569_vm13, %vm570_vm12  ;;  %v590_v14 = vand.u32 2147483648, %v496_v57 }
 0x253   :  { %v566_v60 = vsub.f32 1.0, %v565_v56  ;;  %v563_v0 = vmul.f32 %v1633_v21, %v562_v61  ;;  %v588_v23 = vand.u32 2147483647, %v496_v57  ;;  %vm584_vm1 = vweird.f32 %v496_v57 }
 0x254   :  { %v1689_v62 = vpop.eup %1322  ;;  %v479_v63 = vmul.f32 1.442695, %v451_v15  ;;  %v591_v20 = vor.u32 1.1754944e-38, %v590_v14 }
 0x255   :  { %v567_v1 = vmul.f32 %v1321_v26, %v566_v60  ;;  %509 = vadd.xlane.f32.xlu0 %v1689_v62  ;;  %1019 = vst [vmem:[#allocation12 + $0x10] sm:$0xff] %v563_v0  ;;  %vm589_vm3 = vcmp.eq.f32.partialorder %v588_v23, 8.507059e+37 }
 0x256   :  { %1326 = vpow2.f32 %v479_v63 }
 0x257   :  { %v568_v4 = vadd.f32 %v1321_v26, %v567_v1 }
 0x258   :  { %v1325_v5 = vpop.eup %1324 }
 0x259   :  { %v580_v31 = vmul.f32 %v1325_v5, %v496_v57  ;;  %v434_v6 = vpop.xlane.xlu1 %433  ;;  %v498_v7 = vpop.xlane.xlu2 %497  ;;  %v572_v8 = vsel %vm571_vm14, %v1321_v26, %v568_v4  ;;  %vm585_vm0 = vweird.f32 %v1325_v5 }
 0x25a   :  { %v452_v11 = vsub.f32 %v1652_v38, %v434_v6  ;;  %1328 = vrcp.f32 %v498_v7  ;;  %v577_v12 = vsel %vm574_vm15, %v576_v10, %v572_v8  ;;  %vm586_vm2 = vmor %vm584_vm1, %vm585_vm0  ;;  %v605_v40 = vand.u32 2147483648, %v498_v7 }
 0x25b   :  { %v581_v21 = vsub.f32 1.0, %v580_v31  ;;  %v578_v17 = vmul.f32 %v1640_v27, %v577_v12  ;;  %v603_v41 = vand.u32 2147483647, %v498_v7  ;;  %vm599_vm5 = vweird.f32 %v498_v7 }
 0x25c   :  { %v1694_v13 = vpop.eup %1326  ;;  %v481_v16 = vmul.f32 1.442695, %v452_v11  ;;  %v606_v53 = vor.u32 1.1754944e-38, %v605_v40 }
 0x25d   :  { %v582_v18 = vmul.f32 %v1325_v5, %v581_v21  ;;  %511 = vadd.xlane.f32.xlu1 %v1694_v13  ;;  %v760_v19 = vpack.c.bf16 %v578_v17, %v563_v0  ;;  %1020 = vst [vmem:[#allocation12 + $0x18] sm:$0xff] %v578_v17  ;;  %vm604_vm7 = vcmp.eq.f32.partialorder %v603_v41, 8.507059e+37 }
 0x25e   :  { %1330 = vpow2.f32 %v481_v16 }
 0x25f   :  { %v583_v38 = vadd.f32 %v1325_v5, %v582_v18  ;;  %844 = vmatmul.bf16.gmra.mxu2 %v760_v19 }
 0x260   :  { %v1329_v24 = vpop.eup %1328 }
 0x261   :  { %v595_v25 = vmul.f32 %v1329_v24, %v498_v7  ;;  %v500_v28 = vpop.xlane.xlu2 %499  ;;  %v436_v29 = vpop.xlane.xlu1 %435  ;;  %v587_v30 = vsel %vm586_vm2, %v1325_v5, %v583_v38  ;;  %vm600_vm4 = vweird.f32 %v1329_v24 }
 0x262   :  { %1332 = vrcp.f32 %v500_v28  ;;  %v453_v27 = vsub.f32 %v1660_v44, %v436_v29  ;;  %v592_v34 = vsel %vm589_vm3, %v591_v20, %v587_v30  ;;  %vm601_vm6 = vmor %vm599_vm5, %vm600_vm4  ;;  %v620_v57 = vand.u32 2147483648, %v500_v28  ;;  %v1271_v30 = vld [vmem:[#allocation10 + $0x38] sm:$0xff]  ;;  %v1269_v20 = vld [vmem:[#allocation10 + $0x28] sm:$0xff] }
 0x263   :  { %v596_v33 = vsub.f32 1.0, %v595_v25  ;;  %v593_v37 = vmul.f32 %v1647_v32, %v592_v34  ;;  %v618_v15 = vand.u32 2147483647, %v500_v28  ;;  %vm614_vm9 = vweird.f32 %v500_v28  ;;  %952 = vmatpush.bf16.msra.mxu3 %v1271_v30  ;;  %v1266_v34 = vld [vmem:[#allocation10 + $0x10] sm:$0xff] }
 0x264   :  { %v1699_v35 = vpop.eup %1330  ;;  %v483_v36 = vmul.f32 1.442695, %v453_v27  ;;  %v621_v63 = vor.u32 1.1754944e-38, %v620_v57  ;;  %v1268_v27 = vld [vmem:[#allocation10 + $0x20] sm:$0xff] }
 0x265   :  { %v597_v9 = vmul.f32 %v1329_v24, %v596_v33  ;;  %513 = vadd.xlane.f32.xlu2 %v1699_v35  ;;  %1021 = vst [vmem:[#allocation12 + $0x20] sm:$0xff] %v593_v37  ;;  %vm619_vm11 = vcmp.eq.f32.partialorder %v618_v15, 8.507059e+37  ;;  %v1267_v33 = vld [vmem:[#allocation10 + $0x18] sm:$0xff] }
 0x266   :  { %1334 = vpow2.f32 %v483_v36  ;;  %v1265_v36 = vld [vmem:[#allocation10 + $0x8] sm:$0xff] }
 0x267   :  { %v598_v43 = vadd.f32 %v1329_v24, %v597_v9  ;;  %v1264_v9 = vld [vmem:[#allocation10] sm:$0xff] }
 0x268   :  { %v1333_v46 = vpop.eup %1332 }
 0x269   :  { %v610_v44 = vmul.f32 %v1333_v46, %v500_v28  ;;  %v502_v47 = vpop.xlane.xlu0 %501  ;;  %v438_v49 = vpop.xlane.xlu2 %437  ;;  %v602_v50 = vsel %vm601_vm6, %v1329_v24, %v598_v43  ;;  %vm615_vm8 = vweird.f32 %v1333_v46 }
 0x26a   :  { %1336 = vrcp.f32 %v502_v47  ;;  %v454_v32 = vsub.f32 %v1668_v51, %v438_v49  ;;  %v607_v26 = vsel %vm604_vm7, %v606_v53, %v602_v50  ;;  %vm616_vm10 = vmor %vm614_vm9, %vm615_vm8  ;;  %v635_v31 = vand.u32 2147483648, %v502_v47 }
 0x26b   :  { %v611_v55 = vsub.f32 1.0, %v610_v44  ;;  %v608_v58 = vmul.f32 %v1654_v39, %v607_v26  ;;  %v633_v7 = vand.u32 2147483647, %v502_v47  ;;  %vm629_vm13 = vweird.f32 %v502_v47 }
 0x26c   :  { %v1704_v56 = vpop.eup %1334  ;;  %v485_v48 = vmul.f32 1.442695, %v454_v32  ;;  %v636_v11 = vor.u32 1.1754944e-38, %v635_v31 }
 0x26d   :  { %v612_v59 = vmul.f32 %v1333_v46, %v611_v55  ;;  %515 = vadd.xlane.f32.xlu0 %v1704_v56  ;;  %v761_v60 = vpack.c.bf16 %v608_v58, %v593_v37  ;;  %1022 = vst [vmem:[#allocation12 + $0x28] sm:$0xff] %v608_v58  ;;  %vm634_vm15 = vcmp.eq.f32.partialorder %v633_v7, 8.507059e+37 }
 0x26e   :  { %1338 = vpow2.f32 %v485_v48 }
 0x26f   :  { %v613_v61 = vadd.f32 %v1333_v46, %v612_v59  ;;  %849 = vmatmul.bf16.gmra.mxu2 %v761_v60 }
 0x270   :  { %v1337_v51 = vpop.eup %1336 }
 0x271   :  { %v625_v0 = vmul.f32 %v1337_v51, %v502_v47  ;;  %v504_v1 = vpop.xlane.xlu0 %503  ;;  %v617_v2 = vsel %vm616_vm10, %v1333_v46, %v613_v61  ;;  %vm630_vm12 = vweird.f32 %v1337_v51 }
 0x272   :  { %1340 = vrcp.f32 %v504_v1  ;;  %v622_v39 = vsel %vm619_vm11, %v621_v63, %v617_v2  ;;  %vm631_vm14 = vmor %vm629_vm13, %vm630_vm12  ;;  %v650_v18 = vand.u32 2147483648, %v504_v1  ;;  %v648_v23 = vand.u32 2147483647, %v504_v1 }
 0x273   :  { %v626_v3 = vsub.f32 1.0, %v625_v0  ;;  %v623_v4 = vmul.f32 %v1662_v45, %v622_v39  ;;  %vm644_vm1 = vweird.f32 %v504_v1 }
 0x274   :  { %v1709_v5 = vpop.eup %1338  ;;  %v651_v24 = vor.u32 1.1754944e-38, %v650_v18  ;;  %vm649_vm3 = vcmp.eq.f32.partialorder %v648_v23, 8.507059e+37 }
 0x275   :  { %v627_v6 = vmul.f32 %v1337_v51, %v626_v3  ;;  %517 = vadd.xlane.f32.xlu1 %v1709_v5  ;;  %1023 = vst [vmem:[#allocation12 + $0x30] sm:$0xff] %v623_v4 }
 0x277   :  { %v628_v8 = vadd.f32 %v1337_v51, %v627_v6 }
 0x278   :  { %v1341_v10 = vpop.eup %1340 }
 0x279   :  { %v640_v21 = vmul.f32 %v1341_v10, %v504_v1  ;;  %v632_v12 = vsel %vm631_vm14, %v1337_v51, %v628_v8  ;;  %vm645_vm0 = vweird.f32 %v1341_v10 }
 0x27a   :  { %v637_v16 = vsel %vm634_vm15, %v636_v11, %v632_v12  ;;  %vm646_vm2 = vmor %vm644_vm1, %vm645_vm0 }
 0x27b   :  { %v641_v17 = vsub.f32 1.0, %v640_v21  ;;  %v638_v45 = vmul.f32 %v1670_v52, %v637_v16  ;;  %v1270_v52 = vld [vmem:[#allocation10 + $0x30] sm:$0xff] }
 0x27c   :  { %953 = vmatpush.bf16.msra.mxu3 %v1270_v52 }
 0x27d   :  { %v642_v14 = vmul.f32 %v1341_v10, %v641_v17  ;;  %v762_v19 = vpack.c.bf16 %v638_v45, %v623_v4  ;;  %1024 = vst [vmem:[#allocation12 + $0x38] sm:$0xff] %v638_v45 }
 0x27f   :  { %v643_v38 = vadd.f32 %v1341_v10, %v642_v14  ;;  %854 = vmatmul.bf16.gmra.mxu2 %v762_v19 }
 0x280   :  { %954 = vmatpush.bf16.msra.mxu3 %v1269_v20 }
 0x281   :  { %v647_v25 = vsel %vm646_vm2, %v1341_v10, %v643_v38 }
 0x282   :  { %v652_v28 = vsel %vm649_vm3, %v651_v24, %v647_v25 }
 0x283   :  { %v653_v29 = vmul.f32 %v1674_v54, %v652_v28 }
 0x284   :  { %955 = vmatpush.bf16.msra.mxu3 %v1268_v27 }
 0x285   :  { %1025 = vst [vmem:[#allocation12 + $0x40] sm:$0xff] %v653_v29 }
 0x288   :  { %956 = vmatpush.bf16.msra.mxu3 %v1267_v33 }
 0x28c   :  { %957 = vmatpush.bf16.msra.mxu3 %v1266_v34 }
 0x290   :  { %958 = vmatpush.bf16.msra.mxu3 %v1265_v36 }
 0x294   :  { %959 = vmatpush.bf16.msra.mxu3 %v1264_v9 }
 0x2b8   :  { %v506_v37 = vpop.xlane.xlu1 %505 }
 0x2b9   :  { %1342 = vrcp.f32 %v506_v37  ;;  %v665_v46 = vand.u32 2147483648, %v506_v37  ;;  %v663_v47 = vand.u32 2147483647, %v506_v37  ;;  %vm659_vm5 = vweird.f32 %v506_v37 }
 0x2bb   :  { %v666_v53 = vor.u32 1.1754944e-38, %v665_v46  ;;  %vm664_vm7 = vcmp.eq.f32.partialorder %v663_v47, 8.507059e+37 }
 0x2bf   :  { %v1343_v54 = vpop.eup %1342 }
 0x2c0   :  { %v655_v40 = vmul.f32 %v1343_v54, %v506_v37  ;;  %v508_v41 = vpop.xlane.xlu2 %507  ;;  %vm660_vm4 = vweird.f32 %v1343_v54 }
 0x2c1   :  { %1344 = vrcp.f32 %v508_v41  ;;  %vm661_vm6 = vmor %vm659_vm5, %vm660_vm4  ;;  %v680_v59 = vand.u32 2147483648, %v508_v41  ;;  %v678_v61 = vand.u32 2147483647, %v508_v41  ;;  %vm674_vm9 = vweird.f32 %v508_v41 }
 0x2c2   :  { %v656_v43 = vsub.f32 1.0, %v655_v40 }
 0x2c3   :  { %v681_v0 = vor.u32 1.1754944e-38, %v680_v59  ;;  %vm679_vm11 = vcmp.eq.f32.partialorder %v678_v61, 8.507059e+37 }
 0x2c4   :  { %v657_v44 = vmul.f32 %v1343_v54, %v656_v43 }
 0x2c6   :  { %v658_v49 = vadd.f32 %v1343_v54, %v657_v44 }
 0x2c7   :  { %v1345_v50 = vpop.eup %1344 }
 0x2c8   :  { %v670_v32 = vmul.f32 %v1345_v50, %v508_v41  ;;  %v510_v55 = vpop.xlane.xlu0 %509  ;;  %v662_v26 = vsel %vm661_vm6, %v1343_v54, %v658_v49  ;;  %vm675_vm8 = vweird.f32 %v1345_v50 }
 0x2c9   :  { %1346 = vrcp.f32 %v510_v55  ;;  %v667_v57 = vsel %vm664_vm7, %v666_v53, %v662_v26  ;;  %vm676_vm10 = vmor %vm674_vm9, %vm675_vm8  ;;  %v695_v7 = vand.u32 2147483648, %v510_v55  ;;  %v693_v8 = vand.u32 2147483647, %v510_v55 }
 0x2ca   :  { %v671_v48 = vsub.f32 1.0, %v670_v32  ;;  %v668_v58 = vmul.f32 %v1679_v22, %v667_v57  ;;  %vm689_vm13 = vweird.f32 %v510_v55 }
 0x2cb   :  { %v696_v17 = vor.u32 1.1754944e-38, %v695_v7  ;;  %vm694_vm15 = vcmp.eq.f32.partialorder %v693_v8, 8.507059e+37 }
 0x2cc   :  { %v672_v15 = vmul.f32 %v1345_v50, %v671_v48  ;;  %v763_v60 = vpack.c.bf16 %v668_v58, %v653_v29  ;;  %1026 = vst [vmem:[#allocation12 + $0x48] sm:$0xff] %v668_v58 }
 0x2ce   :  { %859 = vmatmul.bf16.gmra.mxu2 %v763_v60  ;;  %v673_v51 = vadd.f32 %v1345_v50, %v672_v15 }
 0x2cf   :  { %v1347_v63 = vpop.eup %1346 }
 0x2d0   :  { %v685_v1 = vmul.f32 %v1347_v63, %v510_v55  ;;  %v512_v2 = vpop.xlane.xlu1 %511  ;;  %v677_v39 = vsel %vm676_vm10, %v1345_v50, %v673_v51  ;;  %vm690_vm12 = vweird.f32 %v1347_v63 }
 0x2d1   :  { %1348 = vrcp.f32 %v512_v2  ;;  %v682_v3 = vsel %vm679_vm11, %v681_v0, %v677_v39  ;;  %vm691_vm14 = vmor %vm689_vm13, %vm690_vm12  ;;  %v710_v23 = vand.u32 2147483648, %v512_v2  ;;  %v708_v25 = vand.u32 2147483647, %v512_v2 }
 0x2d2   :  { %v686_v4 = vsub.f32 1.0, %v685_v1  ;;  %v683_v22 = vmul.f32 %v1684_v42, %v682_v3  ;;  %v840_v31 = vpop.f32.mrf.mxu2  ;;  %vm704_vm1 = vweird.f32 %v512_v2 }
 0x2d3   :  { %v711_v27 = vor.u32 1.1754944e-38, %v710_v23  ;;  %vm709_vm3 = vcmp.eq.f32.partialorder %v708_v25, 8.507059e+37 }
 0x2d4   :  { %v687_v6 = vmul.f32 %v1347_v63, %v686_v4  ;;  %1027 = vst [vmem:[#allocation12 + $0x50] sm:$0xff] %v683_v22 }
 0x2d6   :  { %v688_v10 = vadd.f32 %v1347_v63, %v687_v6 }
 0x2d7   :  { %v1349_v11 = vpop.eup %1348 }
 0x2d8   :  { %v700_v21 = vmul.f32 %v1349_v11, %v512_v2  ;;  %v514_v12 = vpop.xlane.xlu2 %513  ;;  %v692_v16 = vsel %vm691_vm14, %v1347_v63, %v688_v10  ;;  %vm705_vm0 = vweird.f32 %v1349_v11 }
 0x2d9   :  { %1350 = vrcp.f32 %v514_v12  ;;  %v697_v18 = vsel %vm694_vm15, %v696_v17, %v692_v16  ;;  %vm706_vm2 = vmor %vm704_vm1, %vm705_vm0  ;;  %v725_v9 = vand.u32 2147483648, %v514_v12  ;;  %v723_v54 = vand.u32 2147483647, %v514_v12 }
 0x2da   :  { %v701_v45 = vsub.f32 1.0, %v700_v21  ;;  %v842_v14 = vpop.f32.mrf.mxu2  ;;  %v698_v42 = vmul.f32 %v1689_v62, %v697_v18  ;;  %vm719_vm5 = vweird.f32 %v514_v12 }
 0x2db   :  { %v880_v38 = vpack.c.bf16 %v842_v14, %v840_v31  ;;  %v726_v43 = vor.u32 1.1754944e-38, %v725_v9  ;;  %vm724_vm7 = vcmp.eq.f32.partialorder %v723_v54, 8.507059e+37 }
 0x2dc   :  { %v702_v19 = vmul.f32 %v1349_v11, %v701_v45  ;;  %v764_v24 = vpack.c.bf16 %v698_v42, %v683_v22  ;;  %1028 = vst [vmem:[#allocation12 + $0x58] sm:$0xff] %v698_v42 }
 0x2dd   :  { %960 = vmatmul.bf16.vlgmr.msra.gmra.mxu3 %v880_v38 }
 0x2de   :  { %v703_v28 = vadd.f32 %v1349_v11, %v702_v19  ;;  %864 = vmatmul.bf16.gmra.mxu2 %v764_v24 }
 0x2df   :  { %v1351_v29 = vpop.eup %1350 }
 0x2e0   :  { %v715_v30 = vmul.f32 %v1351_v29, %v514_v12  ;;  %v516_v52 = vpop.xlane.xlu0 %515  ;;  %v707_v20 = vsel %vm706_vm2, %v1349_v11, %v703_v28  ;;  %vm720_vm4 = vweird.f32 %v1351_v29 }
 0x2e1   :  { %1352 = vrcp.f32 %v516_v52  ;;  %v712_v33 = vsel %vm709_vm3, %v711_v27, %v707_v20  ;;  %vm721_vm6 = vmor %vm719_vm5, %vm720_vm4  ;;  %v740_v53 = vand.u32 2147483648, %v516_v52  ;;  %v738_v26 = vand.u32 2147483647, %v516_v52 }
 0x2e2   :  { %v716_v62 = vsub.f32 1.0, %v715_v30  ;;  %v845_v34 = vpop.f32.mrf.mxu2  ;;  %v713_v36 = vmul.f32 %v1694_v13, %v712_v33  ;;  %vm734_vm9 = vweird.f32 %v516_v52 }
 0x2e3   :  { %v741_v15 = vor.u32 1.1754944e-38, %v740_v53  ;;  %vm739_vm11 = vcmp.eq.f32.partialorder %v738_v26, 8.507059e+37 }
 0x2e4   :  { %v717_v37 = vmul.f32 %v1351_v29, %v716_v62  ;;  %1029 = vst [vmem:[#allocation12 + $0x60] sm:$0xff] %v713_v36 }
 0x2e6   :  { %v718_v40 = vadd.f32 %v1351_v29, %v717_v37 }
 0x2e7   :  { %v1353_v41 = vpop.eup %1352 }
 0x2e8   :  { %v730_v46 = vmul.f32 %v1353_v41, %v516_v52  ;;  %v518_v44 = vpop.xlane.xlu1 %517  ;;  %v722_v47 = vsel %vm721_vm6, %v1351_v29, %v718_v40  ;;  %vm735_vm8 = vweird.f32 %v1353_v41 }
 0x2e9   :  { %1354 = vrcp.f32 %v518_v44  ;;  %v727_v50 = vsel %vm724_vm7, %v726_v43, %v722_v47  ;;  %vm736_vm10 = vmor %vm734_vm9, %vm735_vm8  ;;  %v755_v0 = vand.u32 2147483648, %v518_v44  ;;  %v753_v39 = vand.u32 2147483647, %v518_v44 }
 0x2ea   :  { %v731_v49 = vsub.f32 1.0, %v730_v46  ;;  %v847_v32 = vpop.f32.mrf.mxu2  ;;  %v728_v13 = vmul.f32 %v1699_v35, %v727_v50  ;;  %vm749_vm13 = vweird.f32 %v518_v44 }
 0x2eb   :  { %v881_v57 = vpack.c.bf16 %v847_v32, %v845_v34  ;;  %v756_v4 = vor.u32 1.1754944e-38, %v755_v0  ;;  %vm754_vm15 = vcmp.eq.f32.partialorder %v753_v39, 8.507059e+37 }
 0x2ec   :  { %v732_v55 = vmul.f32 %v1353_v41, %v731_v49  ;;  %v765_v48 = vpack.c.bf16 %v728_v13, %v713_v36  ;;  %1030 = vst [vmem:[#allocation12 + $0x68] sm:$0xff] %v728_v13 }
 0x2ed   :  { %965 = vmatmul.bf16.gmra.mxu3 %v881_v57 }
 0x2ee   :  { %v733_v58 = vadd.f32 %v1353_v41, %v732_v55  ;;  %869 = vmatmul.bf16.gmra.mxu2 %v765_v48 }
 0x2ef   :  { %v1355_v59 = vpop.eup %1354 }
 0x2f0   :  { %v745_v60 = vmul.f32 %v1355_v59, %v518_v44  ;;  %v737_v61 = vsel %vm736_vm10, %v1353_v41, %v733_v58  ;;  %vm750_vm12 = vweird.f32 %v1355_v59 }
 0x2f1   :  { %v742_v51 = vsel %vm739_vm11, %v741_v15, %v737_v61  ;;  %vm751_vm14 = vmor %vm749_vm13, %vm750_vm12 }
 0x2f2   :  { %v746_v63 = vsub.f32 1.0, %v745_v60  ;;  %v743_v35 = vmul.f32 %v1704_v56, %v742_v51  ;;  %v850_v1 = vpop.f32.mrf.mxu2 }
 0x2f4   :  { %v747_v2 = vmul.f32 %v1355_v59, %v746_v63  ;;  %1031 = vst [vmem:[#allocation12 + $0x70] sm:$0xff] %v743_v35 }
 0x2f6   :  { %v748_v3 = vadd.f32 %v1355_v59, %v747_v2 }
 0x2f8   :  { %v752_v22 = vsel %vm751_vm14, %v1355_v59, %v748_v3 }
 0x2f9   :  { %v757_v31 = vsel %vm754_vm15, %v756_v4, %v752_v22 }
 0x2fa   :  { %v758_v6 = vmul.f32 %v1709_v5, %v757_v31  ;;  %v852_v7 = vpop.f32.mrf.mxu2 }
 0x2fb   :  { %v882_v8 = vpack.c.bf16 %v852_v7, %v850_v1 }
 0x2fc   :  { %v766_v10 = vpack.c.bf16 %v758_v6, %v743_v35  ;;  %1032 = vst [vmem:[#allocation12 + $0x78] sm:$0xff] %v758_v6 }
 0x2fd   :  { %970 = vmatmul.bf16.gmra.mxu3 %v882_v8  ;;  %1058 = dma.vmem_to_hbm [thread:$0]  %s1051_s25, 2048, %s1053_s28, [#allocation13], %s1542_s29, %s1542_s29, %s1543_s30  }
 0x2fe   :  { %874 = vmatmul.bf16.gmra.mxu2 %v766_v10 }
 0x302   :  { %v855_v56 = vpop.f32.mrf.mxu2 }
 0x30a   :  { %v857_v11 = vpop.f32.mrf.mxu2 }
 0x30b   :  { %v883_v21 = vpack.c.bf16 %v857_v11, %v855_v56 }
 0x30d   :  { %975 = vmatmul.bf16.gmra.mxu3 %v883_v21 }
 0x351   :  { %v860_v12 = vpop.f32.mrf.mxu2 }
 0x359   :  { %v862_v16 = vpop.f32.mrf.mxu2 }
 0x35a   :  { %v884_v17 = vpack.c.bf16 %v862_v16, %v860_v12 }
 0x35c   :  { %980 = vmatmul.bf16.gmra.mxu3 %v884_v17 }
 0x360   :  { %v961_v45 = vpop.f32.mrf.mxu3 }
 0x361   :  { %1001 = vst [vmem:[#allocation11] sm:$0xff] %v961_v45  ;;  %v865_v18 = vpop.f32.mrf.mxu2 }
 0x368   :  { %v963_v14 = vpop.f32.mrf.mxu3 }
 0x369   :  { %1002 = vst [vmem:[#allocation11 + $0x8] sm:$0xff] %v963_v14  ;;  %v867_v5 = vpop.f32.mrf.mxu2 }
 0x36a   :  { %v885_v42 = vpack.c.bf16 %v867_v5, %v865_v18 }
 0x36c   :  { %985 = vmatmul.bf16.gmra.mxu3 %v885_v42 }
 0x370   :  { %v966_v19 = vpop.f32.mrf.mxu3 }
 0x371   :  { %1003 = vst [vmem:[#allocation11 + $0x10] sm:$0xff] %v966_v19  ;;  %v870_v23 = vpop.f32.mrf.mxu2 }
 0x378   :  { %v968_v38 = vpop.f32.mrf.mxu3 }
 0x379   :  { %1004 = vst [vmem:[#allocation11 + $0x18] sm:$0xff] %v968_v38  ;;  %v872_v24 = vpop.f32.mrf.mxu2 }
 0x37a   :  { %v886_v25 = vpack.c.bf16 %v872_v24, %v870_v23 }
 0x37c   :  { %990 = vmatmul.bf16.gmra.mxu3 %v886_v25 }
 0x380   :  { %v971_v28 = vpop.f32.mrf.mxu3 }
 0x381   :  { %1005 = vst [vmem:[#allocation11 + $0x20] sm:$0xff] %v971_v28  ;;  %v875_v29 = vpop.f32.mrf.mxu2 }
 0x388   :  { %v973_v30 = vpop.f32.mrf.mxu3 }
 0x389   :  { %1006 = vst [vmem:[#allocation11 + $0x28] sm:$0xff] %v973_v30  ;;  %v877_v52 = vpop.f32.mrf.mxu2 }
 0x38a   :  { %v887_v20 = vpack.c.bf16 %v877_v52, %v875_v29 }
 0x38c   :  { %995 = vmatmul.bf16.gmra.mxu3 %v887_v20 }
 0x390   :  { %v976_v27 = vpop.f32.mrf.mxu3 }
 0x391   :  { %1007 = vst [vmem:[#allocation11 + $0x30] sm:$0xff] %v976_v27 }
 0x398   :  { %v978_v62 = vpop.f32.mrf.mxu3 }
 0x399   :  { %1008 = vst [vmem:[#allocation11 + $0x38] sm:$0xff] %v978_v62 }
 0x3df   :  { %v981_v33 = vpop.f32.mrf.mxu3 }
 0x3e0   :  { %1009 = vst [vmem:[#allocation11 + $0x40] sm:$0xff] %v981_v33 }
 0x3e7   :  { %v983_v34 = vpop.f32.mrf.mxu3 }
 0x3e8   :  { %1010 = vst [vmem:[#allocation11 + $0x48] sm:$0xff] %v983_v34 }
 0x3ef   :  { %v986_v36 = vpop.f32.mrf.mxu3 }
 0x3f0   :  { %1011 = vst [vmem:[#allocation11 + $0x50] sm:$0xff] %v986_v36 }
 0x3f7   :  { %v988_v37 = vpop.f32.mrf.mxu3 }
 0x3f8   :  { %1012 = vst [vmem:[#allocation11 + $0x58] sm:$0xff] %v988_v37 }
 0x3ff   :  { %v991_v9 = vpop.f32.mrf.mxu3 }
 0x400   :  { %1013 = vst [vmem:[#allocation11 + $0x60] sm:$0xff] %v991_v9 }
 0x407   :  { %v993_v54 = vpop.f32.mrf.mxu3 }
 0x408   :  { %1014 = vst [vmem:[#allocation11 + $0x68] sm:$0xff] %v993_v54 }
 0x40f   :  { %v996_v40 = vpop.f32.mrf.mxu3 }
 0x410   :  { %1015 = vst [vmem:[#allocation11 + $0x70] sm:$0xff] %v996_v40 }
 0x417   :  { %v998_v41 = vpop.f32.mrf.mxu3 }
 0x418   :  { %1016 = vst [vmem:[#allocation11 + $0x78] sm:$0xff] %v998_v41 }
 0x419   :  { %1045 = dma.vmem_to_hbm [thread:$0]  %s1038_s8, 2048, %s1040_s11, [#allocation4], %s1542_s29, %s1542_s29, %s1543_s30  }
 0x41a   :  { %1530 = dma.done.wait [#allocation4], 2048  }
 0x41b   :  { %1531 = vsyncadd [#allocation4], 4294965248 }
 0x41c   :  { %1532 = dma.done.wait [#allocation13], 2048  }
 0x41d   :  { %1533 = vsyncadd [#allocation13], 4294965248 }
 0x41e   :  { %1067 = vsyncpa [#allocation3], 1 }
 0x41f   :  { %1068 = vsyncpa [#allocation6], 1 }
 0x420   :  { %1069 = vsyncpa [#allocation9], 1 }
 0x421   :  { %1070 = vsyncpa [#allocation4], 1 }
 0x422   :  { %1071 = vsyncpa [#allocation13], 1 }

</bundles_post_ra>
